<compile_context>
chip_gen: v7x
topology: tpu7x:2x2x1
jax: 0.10.0
libtpu: 0.0.40
codegen_flags: <defaults>
</compile_context>

<pallas_src>
import jax
import jax.numpy as jnp
from jax.experimental import pallas as pl
from jax.experimental.pallas import tpu as pltpu

GCN_OUT = 256
BERT_OUT = 1024
GCN_DIM = GCN_OUT * 3            # 768
IN_DIM = BERT_OUT + GCN_DIM      # 1792
HID_DIM = 256
OUT_DIM = 2
OUT_PAD = 128                    # lane-dense padded output width
EPS = 1e-5


def _round_up(x, m):
    return ((x + m - 1) // m) * m


def _ceil_div(a, b):
    return -(-a // b)


# ---------------------------------------------------------------------------
# Kernel: h = ReLU(xg @ W1g + xb @ W1b + b1) ; out = h @ W2p + b2p
# (BN1/BN2 already folded into W1*/b1 and W2p/b2p on the host.  Activations and
#  weights arrive already in the matmul dtype -> no wide in-kernel casts.)
# ---------------------------------------------------------------------------
def head_kernel(xg_ref, xb_ref, w1g_ref, w1b_ref, b1_ref, w2_ref, b2_ref, out_ref):
    h = jnp.dot(xg_ref[...], w1g_ref[...], preferred_element_type=jnp.float32)
    h = h + jnp.dot(xb_ref[...], w1b_ref[...], preferred_element_type=jnp.float32)
    h = h + b1_ref[...]                       # b1 is f32 (BN1-folded)
    h = jnp.maximum(h, 0.0)                   # ReLU (Dropout = identity, eval)

    out = jnp.dot(h.astype(w2_ref.dtype), w2_ref[...],
                  preferred_element_type=jnp.float32) + b2_ref[...]
    out_ref[...] = out.astype(out_ref.dtype)  # lane-dense (bt, 128) store


def head_forward(gcn_x, bert_x, folded, *, batch_tile=None, min_grid_steps=None,
                 out_dtype=None):
    """gcn_x: (B, 768), bert_x: (B, 1024) -> (B, 2) in the activation dtype."""
    w1g, w1b, b1, w2p, b2p = folded
    act_dtype = jnp.dtype(w1g.dtype)
    gcn_x = gcn_x.astype(act_dtype)           # no-op if wrapper already cast
    bert_x = bert_x.astype(act_dtype)
    if out_dtype is None:
        out_dtype = act_dtype
    B = gcn_x.shape[0]

    # ---- adaptive batch tiling -------------------------------------------
    if batch_tile is None:
        batch_tile = 1024 if act_dtype == jnp.bfloat16 else 512
    batch_tile = max(8, _round_up(batch_tile, 8))
    if min_grid_steps is None:
        # >=2 grid steps so v7x's second TensorCore gets work ("parallel" axis);
        # skip for tiny batches where splitting would double padding.
        min_grid_steps = 2 if B > 8 else 1
    n_steps = max(_ceil_div(B, batch_tile), min_grid_steps)
    bt = _round_up(_ceil_div(B, n_steps), 8)  # caps padding waste at < 8 + bt/B slack
    Bp = n_steps * bt
    if Bp != B:
        gcn_x = jnp.pad(gcn_x, ((0, Bp - B), (0, 0)))
        bert_x = jnp.pad(bert_x, ((0, Bp - B), (0, 0)))

    grid = (n_steps,)
    batch_map = lambda i: (i, 0)
    full_map = lambda i: (0, 0)

    in_specs = [
        pl.BlockSpec((bt, GCN_DIM), batch_map),        # gathered GCN features
        pl.BlockSpec((bt, BERT_OUT), batch_map),       # BERT CLS token
        pl.BlockSpec((GCN_DIM, HID_DIM), full_map),    # W1 (gcn rows), BN1-folded
        pl.BlockSpec((BERT_OUT, HID_DIM), full_map),   # W1 (bert rows), BN1-folded
        pl.BlockSpec((1, HID_DIM), full_map),          # b1 (BN1-folded, f32)
        pl.BlockSpec((HID_DIM, OUT_PAD), full_map),    # W2 (BN2-folded, lane-padded)
        pl.BlockSpec((1, OUT_PAD), full_map),          # b2 (BN2-folded, f32)
    ]
    out_spec = pl.BlockSpec((bt, OUT_PAD), batch_map)

    # ---- VMEM footprint estimate (double-buffered) -> raise limit only if needed
    act_b = act_dtype.itemsize
    out_b = jnp.dtype(out_dtype).itemsize
    est = (2 * bt * (GCN_DIM + BERT_OUT) * act_b            # activation tiles
           + 2 * bt * OUT_PAD * out_b                       # output tile
           + 2 * (IN_DIM * HID_DIM + HID_DIM * OUT_PAD) * act_b   # weights
           + 2 * (HID_DIM + OUT_PAD) * 4)                   # biases (f32)
    cp_kwargs = dict(dimension_semantics=("parallel",))     # batch tiles independent
    if est > (14 << 20):                                    # v5e default scoped VMEM ~16 MiB
        cp_kwargs["vmem_limit_bytes"] = min(int(est * 5 // 4), 48 << 20)

    out = pl.pallas_call(
        head_kernel,
        out_shape=jax.ShapeDtypeStruct((Bp, OUT_PAD), out_dtype),
        grid_spec=pltpu.PrefetchScalarGridSpec(
            num_scalar_prefetch=0,
            grid=grid,
            in_specs=in_specs,
            out_specs=out_spec,
        ),
        compiler_params=pltpu.CompilerParams(**cp_kwargs),
    )(gcn_x, bert_x, w1g, w1b, b1, w2p, b2p)

    return out[:B, :OUT_DIM]


# ---------------------------------------------------------------------------
# Host-side parameter preparation
# ---------------------------------------------------------------------------
def make_params(key):
    """Raw (unfolded) parameters matching PyTorch init; weights stored (in, out)."""
    k1, k2 = jax.random.split(key)
    w1 = (jax.random.normal(k1, (IN_DIM, HID_DIM), jnp.float32)
          * jnp.sqrt(2.0 / IN_DIM))                      # kaiming_normal_, fan_in
    b1 = jnp.zeros((1, HID_DIM), jnp.float32)
    w2 = (jax.random.normal(k2, (HID_DIM, OUT_DIM), jnp.float32)
          * jnp.sqrt(2.0 / HID_DIM))
    b2 = jnp.zeros((1, OUT_DIM), jnp.float32)
    bn1_g = jnp.ones((1, IN_DIM), jnp.float32)
    bn1_b = jnp.zeros((1, IN_DIM), jnp.float32)
    bn1_m = jnp.zeros((1, IN_DIM), jnp.float32)
    bn1_v = jnp.ones((1, IN_DIM), jnp.float32)
    bn2_g = jnp.ones((1, HID_DIM), jnp.float32)
    bn2_b = jnp.zeros((1, HID_DIM), jnp.float32)
    bn2_m = jnp.zeros((1, HID_DIM), jnp.float32)
    bn2_v = jnp.ones((1, HID_DIM), jnp.float32)
    return (bn1_g, bn1_b, bn1_m, bn1_v, w1, b1,
            bn2_g, bn2_b, bn2_m, bn2_v, w2, b2)


def fold_params(params, *, matmul_dtype=jnp.bfloat16):
    """Fold eval-mode BatchNorms into the Linear weights/biases; pad out dim to 128.

    matmul_dtype=bf16 is the production default (required for v7x's MXU, 3-6x on
    v6e, halves weight + activation DMA).  Use jnp.float32 for bit-tight checks.
    """
    (bn1_g, bn1_b, bn1_m, bn1_v, w1, b1,
     bn2_g, bn2_b, bn2_m, bn2_v, w2, b2) = params

    a1 = bn1_g * jax.lax.rsqrt(bn1_v + EPS)          # (1, IN_DIM)
    c1 = bn1_b - bn1_m * a1
    w1f = w1 * a1.reshape(IN_DIM, 1)                 # (IN_DIM, HID)
    b1f = c1 @ w1 + b1                               # (1, HID)

    a2 = bn2_g * jax.lax.rsqrt(bn2_v + EPS)          # (1, HID)
    c2 = bn2_b - bn2_m * a2
    w2f = w2 * a2.reshape(HID_DIM, 1)                # (HID, OUT_DIM)
    b2f = c2 @ w2 + b2                               # (1, OUT_DIM)

    # Split W1 by the concat layout: [gcn (768) | bert (1024)].
    w1g = w1f[:GCN_DIM]
    w1b = w1f[GCN_DIM:]

    # Lane-dense padding of the tiny output dimension.
    w2p = jnp.zeros((HID_DIM, OUT_PAD), jnp.float32).at[:, :OUT_DIM].set(w2f)
    b2p = jnp.zeros((1, OUT_PAD), jnp.float32).at[:, :OUT_DIM].set(b2f)

    return (w1g.astype(matmul_dtype), w1b.astype(matmul_dtype),
            b1f.astype(jnp.float32),
            w2p.astype(matmul_dtype), b2p.astype(jnp.float32))


# ---------------------------------------------------------------------------
# Full forward (glue) + pure-JAX reference
# ---------------------------------------------------------------------------
def gpr_forward(gcn_outputs, offsets_gcn, cls_token, folded, *, batch_tile=None,
                min_grid_steps=None, out_dtype=None):
    """GPRModel.forward with RGCN outputs supplied as an input (see TODO above)."""
    B = gcn_outputs.shape[0]
    act_dtype = jnp.dtype(folded[0].dtype)
    gathered = jnp.take_along_axis(
        gcn_outputs, offsets_gcn[:, :, None].astype(jnp.int32), axis=1)
    # Cast in the wrapper: XLA fuses it into the gather, so the (B, 768) gathered
    # block and the (B, 1024) CLS block hit HBM already in the matmul dtype.
    gcn_x = gathered.reshape(B, GCN_DIM).astype(act_dtype)
    bert_x = cls_token.astype(act_dtype)
    return head_forward(gcn_x, bert_x, folded, batch_tile=batch_tile,
                        min_grid_steps=min_grid_steps, out_dtype=out_dtype)


def reference_forward(gcn_outputs, offsets_gcn, cls_token, params):
    (bn1_g, bn1_b, bn1_m, bn1_v, w1, b1,
     bn2_g, bn2_b, bn2_m, bn2_v, w2, b2) = params
    B = gcn_outputs.shape[0]
    gathered = jnp.take_along_axis(
        gcn_outputs, offsets_gcn[:, :, None].astype(jnp.int32), axis=1)
    x = jnp.concatenate([gathered.reshape(B, -1), cls_token], axis=1)
    x = (x - bn1_m) * jax.lax.rsqrt(bn1_v + EPS) * bn1_g + bn1_b
    h = jnp.maximum(x @ w1 + b1, 0.0)
    h = (h - bn2_m) * jax.lax.rsqrt(bn2_v + EPS) * bn2_g + bn2_b
    return h @ w2 + b2


if __name__ == "__main__":
    key = jax.random.PRNGKey(0)
    kp, kg, ko, kc = jax.random.split(key, 4)

    B = 16         # batch size (small demo)
    N_NODES = 16   # nodes per graph (RGCN output length)

    params = make_params(kp)
    gcn_outputs = jax.random.normal(kg, (B, N_NODES, GCN_OUT), jnp.float32)
    offsets_gcn = jax.random.randint(ko, (B, 3), 0, N_NODES, jnp.int32)
    cls_token = jax.random.normal(kc, (B, BERT_OUT), jnp.float32)

    ref = reference_forward(gcn_outputs, offsets_gcn, cls_token, params)

    # ---- 1) f32 path: exact-math validation (tight tolerance). ------------
    folded_f32 = fold_params(params, matmul_dtype=jnp.float32)
    out_f32 = gpr_forward(gcn_outputs, offsets_gcn, cls_token, folded_f32,
                          batch_tile=8)           # forces a multi-step parallel grid
    out_f32 = jax.block_until_ready(out_f32)
    assert out_f32.shape == (B, OUT_DIM), out_f32.shape
    assert jnp.allclose(out_f32, ref, atol=2e-4, rtol=2e-4), (
        float(jnp.max(jnp.abs(out_f32 - ref))))

    # ---- 2) bf16 production path (default tiling, loose tolerance). -------
    folded_bf16 = fold_params(params)             # bf16 weights (default)
    out_bf16 = gpr_forward(gcn_outputs, offsets_gcn, cls_token, folded_bf16)
    out_bf16 = jax.block_until_ready(out_bf16)
    assert out_bf16.shape == (B, OUT_DIM), out_bf16.shape
    assert jnp.allclose(out_bf16.astype(jnp.float32), ref, atol=0.1, rtol=0.05), (
        float(jnp.max(jnp.abs(out_bf16.astype(jnp.float32) - ref))))

    print("KERNEL_OK")
</pallas_src>

<mosaic_0001>
module attributes {stable_mosaic.version = 11 : i64} {
  func.func @head_kernel(%arg0: i32, %arg1: memref<8x768xf32, #tpu.memory_space<vmem>>, %arg2: memref<8x1024xf32, #tpu.memory_space<vmem>>, %arg3: memref<768x256xf32, #tpu.memory_space<vmem>>, %arg4: memref<1024x256xf32, #tpu.memory_space<vmem>>, %arg5: memref<1x256xf32, #tpu.memory_space<vmem>>, %arg6: memref<256x128xf32, #tpu.memory_space<vmem>>, %arg7: memref<1x128xf32, #tpu.memory_space<vmem>>, %arg8: memref<8x128xf32, #tpu.memory_space<vmem>>) attributes {dimension_semantics = [#tpu.dimension_semantics<parallel>], iteration_bounds = array<i64: 2>, scalar_prefetch = 0 : i64, scratch_operands = 0 : i64, tpu.core_type = #tpu.core_type<tc>, window_params = [{transform_indices = @transform_0, window_bounds = array<i64: 8, 768>}, {transform_indices = @transform_1, window_bounds = array<i64: 8, 1024>}, {pipeline_mode = #tpu.pipeline_mode<synchronous>, transform_indices = @transform_2, window_bounds = array<i64: 768, 256>}, {pipeline_mode = #tpu.pipeline_mode<synchronous>, transform_indices = @transform_3, window_bounds = array<i64: 1024, 256>}, {pipeline_mode = #tpu.pipeline_mode<synchronous>, transform_indices = @transform_4, window_bounds = array<i64: 1, 256>}, {pipeline_mode = #tpu.pipeline_mode<synchronous>, transform_indices = @transform_5, window_bounds = array<i64: 256, 128>}, {pipeline_mode = #tpu.pipeline_mode<synchronous>, transform_indices = @transform_6, window_bounds = array<i64: 1, 128>}, {transform_indices = @transform_7, window_bounds = array<i64: 8, 128>}]} {
    %c0 = arith.constant 0 : index
    %c0_0 = arith.constant 0 : index
    %0 = vector.load %arg1[%c0, %c0_0] : memref<8x768xf32, #tpu.memory_space<vmem>>, vector<8x768xf32>
    %c0_1 = arith.constant 0 : index
    %c0_2 = arith.constant 0 : index
    %1 = vector.load %arg3[%c0_1, %c0_2] : memref<768x256xf32, #tpu.memory_space<vmem>>, vector<768x256xf32>
    %cst = arith.constant dense<0.000000e+00> : vector<8x256xf32>
    %2 = tpu.matmul %0, %1, %cst {dimension_numbers = #tpu.dot_dimension_numbers<[1], [0], [0], [1], [0, 0, 1, 1], [], []>} : vector<8x768xf32>, vector<768x256xf32>, vector<8x256xf32> -> vector<8x256xf32>
    %c0_3 = arith.constant 0 : index
    %c0_4 = arith.constant 0 : index
    %3 = vector.load %arg2[%c0_3, %c0_4] : memref<8x1024xf32, #tpu.memory_space<vmem>>, vector<8x1024xf32>
    %c0_5 = arith.constant 0 : index
    %c0_6 = arith.constant 0 : index
    %4 = vector.load %arg4[%c0_5, %c0_6] : memref<1024x256xf32, #tpu.memory_space<vmem>>, vector<1024x256xf32>
    %cst_7 = arith.constant dense<0.000000e+00> : vector<8x256xf32>
    %5 = tpu.matmul %3, %4, %cst_7 {dimension_numbers = #tpu.dot_dimension_numbers<[1], [0], [0], [1], [0, 0, 1, 1], [], []>} : vector<8x1024xf32>, vector<1024x256xf32>, vector<8x256xf32> -> vector<8x256xf32>
    %6 = arith.addf %2, %5 : vector<8x256xf32>
    %c0_8 = arith.constant 0 : index
    %c0_9 = arith.constant 0 : index
    %7 = vector.load %arg5[%c0_8, %c0_9] : memref<1x256xf32, #tpu.memory_space<vmem>>, vector<1x256xf32>
    %8 = vector.broadcast %7 : vector<1x256xf32> to vector<8x256xf32>
    %9 = arith.addf %6, %8 : vector<8x256xf32>
    %cst_10 = arith.constant 0.000000e+00 : f32
    %10 = vector.broadcast %cst_10 : f32 to vector<8x256xf32>
    %11 = arith.maximumf %9, %10 : vector<8x256xf32>
    %c0_11 = arith.constant 0 : index
    %c0_12 = arith.constant 0 : index
    %12 = vector.load %arg6[%c0_11, %c0_12] : memref<256x128xf32, #tpu.memory_space<vmem>>, vector<256x128xf32>
    %cst_13 = arith.constant dense<0.000000e+00> : vector<8x128xf32>
    %13 = tpu.matmul %11, %12, %cst_13 {dimension_numbers = #tpu.dot_dimension_numbers<[1], [0], [0], [1], [0, 0, 1, 1], [], []>} : vector<8x256xf32>, vector<256x128xf32>, vector<8x128xf32> -> vector<8x128xf32>
    %c0_14 = arith.constant 0 : index
    %c0_15 = arith.constant 0 : index
    %14 = vector.load %arg7[%c0_14, %c0_15] : memref<1x128xf32, #tpu.memory_space<vmem>>, vector<1x128xf32>
    %15 = vector.broadcast %14 : vector<1x128xf32> to vector<8x128xf32>
    %16 = arith.addf %13, %15 : vector<8x128xf32>
    %c0_16 = arith.constant 0 : index
    %c0_17 = arith.constant 0 : index
    %17 = vector.load %arg8[%c0_16, %c0_17] : memref<8x128xf32, #tpu.memory_space<vmem>>, vector<8x128xf32>
    tpu.vector_store %arg8[%c0_16, %c0_17], %16 {strides = array<i32>} : memref<8x128xf32, #tpu.memory_space<vmem>>, vector<8x128xf32>,
    return
  }
  func.func @transform_0(%arg0: i32) -> (i32, i32) {
    %c0_i32 = arith.constant 0 : i32
    %c0_i32_0 = arith.constant 0 : i32
    return %arg0, %c0_i32 : i32, i32
  }
  func.func @transform_1(%arg0: i32) -> (i32, i32) {
    %c0_i32 = arith.constant 0 : i32
    %c0_i32_0 = arith.constant 0 : i32
    return %arg0, %c0_i32 : i32, i32
  }
  func.func @transform_2(%arg0: i32) -> (i32, i32) {
    %c0_i32 = arith.constant 0 : i32
    %c0_i32_0 = arith.constant 0 : i32
    %c0_i32_1 = arith.constant 0 : i32
    return %c0_i32, %c0_i32_0 : i32, i32
  }
  func.func @transform_3(%arg0: i32) -> (i32, i32) {
    %c0_i32 = arith.constant 0 : i32
    %c0_i32_0 = arith.constant 0 : i32
    %c0_i32_1 = arith.constant 0 : i32
    return %c0_i32, %c0_i32_0 : i32, i32
  }
  func.func @transform_4(%arg0: i32) -> (i32, i32) {
    %c0_i32 = arith.constant 0 : i32
    %c0_i32_0 = arith.constant 0 : i32
    %c0_i32_1 = arith.constant 0 : i32
    return %c0_i32, %c0_i32_0 : i32, i32
  }
  func.func @transform_5(%arg0: i32) -> (i32, i32) {
    %c0_i32 = arith.constant 0 : i32
    %c0_i32_0 = arith.constant 0 : i32
    %c0_i32_1 = arith.constant 0 : i32
    return %c0_i32, %c0_i32_0 : i32, i32
  }
  func.func @transform_6(%arg0: i32) -> (i32, i32) {
    %c0_i32 = arith.constant 0 : i32
    %c0_i32_0 = arith.constant 0 : i32
    %c0_i32_1 = arith.constant 0 : i32
    return %c0_i32, %c0_i32_0 : i32, i32
  }
  func.func @transform_7(%arg0: i32) -> (i32, i32) {
    %c0_i32 = arith.constant 0 : i32
    %c0_i32_0 = arith.constant 0 : i32
    return %arg0, %c0_i32 : i32, i32
  }
}

</mosaic_0001>

<bundles_post_ra>
// kernel: tpu_custom_call.1
= control target key start
LH: loop header
LB: loop body
LE: loop exit
PB: predicated region body
PF: predicated region fallthrough
CT: control target
= control target key end

     0   :  { %s2826_s0 = inlined_call_operand.hbm [shape: f32[16,768], index: 0, kind: input, shape index: {}]   ;;  %s2827_s1 = inlined_call_operand.hbm [shape: f32[16,1024], index: 1, kind: input, shape index: {}]   ;;  %s2828_s2 = inlined_call_operand.hbm [shape: f32[768,256], index: 2, kind: input, shape index: {}]   ;;  %s2829_s3 = inlined_call_operand.hbm [shape: f32[1024,256], index: 3, kind: input, shape index: {}]   ;;  %s2830_s4 = inlined_call_operand.vmem [shape: f32[1,256], index: 4, kind: input, shape index: {}]   ;;  %s2831_s5 = inlined_call_operand.hbm [shape: f32[256,128], index: 5, kind: input, shape index: {}]   ;;  %s2832_s6 = inlined_call_operand.vmem [shape: f32[1,128], index: 6, kind: input, shape index: {}]   ;;  %s2833_s7 = inlined_call_operand.hbm [shape: f32[16,128], index: 7, kind: output, shape index: {}]  }
   0x1   :  { %2839 = sst [smem:[#allocation18_spill]] %s2826_s0 }
   0x2   :  { %2840 = sst [smem:[#allocation19_spill]] %s2828_s2 }
   0x3   :  { %12 = vsyncpa [#allocation3], 0 }
   0x4   :  { %14 = vsyncpa [#allocation3 + $0x1], 0 }
   0x5   :  { %15 = vsyncpa [#allocation6], 0 }
   0x6   :  { %17 = vsyncpa [#allocation6 + $0x1], 0 }
   0x7   :  { %18 = vsyncpa [#allocation9], 0 }
   0x8   :  { %19 = vsyncpa [#allocation4], 0 }
   0x9   :  { %21 = vsyncpa [#allocation4 + $0x1], 0  ;;  %s2508_s24 = smov 0   ;;  %s2510_s25 = smov 0  }
   0xa   :  { %s2512_s26 = smov 0   ;;  %s2514_s27 = smov 0  }
   0xb LB: > { %s2529_s28 = sadd.s32 4294967295, %s2456_s27   ;;  %s1596_s29 = sadd.s32 4294967294, %s2456_s27   ;;  %s2456_s27 = sphi %s2514_s27, %s2865_s27   ;;  %s2452_s26 = sphi %s2512_s26, %s2864_s26   ;;  %s2448_s25 = sphi %s2510_s25, %s2863_s25   ;;  %s2444_s24 = sphi %s2508_s24, %s2862_s24  }
   0xc   : > { %p47_p0 = scmp.ne.s32.totalorder %s2448_s25, %s2444_s24  ;;  %p2834_p1 = scmp.eq.s32.totalorder %s2529_s28, 0 }
   0xd   : > { %p208_p3 = scmp.eq.s32.totalorder %s1596_s29, 1  ;;  %p1597_p5 = scmp.ge.s32.totalorder %s2456_s27, 1 }
   0xe   : > { %p2538_p4 = por %p2834_p1, %p47_p0  ;;  %p215_p7 = scmp.lt.s32.totalorder %s2456_s27, 3 }
   0xf   : > { %p2543_p6 = por %p208_p3, %p47_p0  ;;  %s2458_s10 = smov [#allocation7]  }
  0x10   : > { %s2841_s30 = scalar_select %p2538_p4, 1, 0 }
  0x11   : > { %s2842_s8 = scalar_select %p2543_p6, 1, 0 }
  0x12   : > { %p2548_p8 = pnand %p1597_p5, %p215_p7  ;;  %s227_s11 = sshll.u32 %s2458_s10, 4  ;;  %s2552_s11 = int_to_ptr.vmem [resolvable:$true] %s227_s11 }
  0x13   : > { %2843 = sst [smem:[#allocation17_spill]] %s2842_s8  ;;  %s2459_s13 = smov [#allocation8]  }
  0x14   : > { %s2844_s9 = scalar_select %p2548_p8, 1, 0 }
  0x15   : > { %p2166_p9 = pneg %p2548_p8  ;;  %s240_s14 = sshll.u32 %s2459_s13, 4  ;;  %s2563_s14 = int_to_ptr.vmem [resolvable:$true] %s240_s14 }
  0x16   : > { %s2460_s15 = smov [#allocation10]   ;;  %s2846_s2 = sld [smem:[#allocation19_spill]] }
  0x17   : > { %p2559_p11 = pnand %p2166_p9, %p2834_p1  ;;  %s2565_s16 = sshll.u32 %s2460_s15, 4  ;;  %s257_s16 = int_to_ptr.vmem [resolvable:$true] %s2565_s16 }
  0x19   : > { %p2575_p13 = pneg %p2559_p11 }
  0x1c   : > { %s2234_s19 = scalar_lea.hbm %s2846_s2, 24576 }
  0x1d   : > { %p2235_p12 = scmp.ne.s32.totalorder %s2846_s2, %s2234_s19  ;;  %p2241_p5 = scmp.lt.u32.totalorder %s2234_s19, %s2846_s2 }
  0x1f   : > { %p2237_p0 = pnand %p2575_p13, %p2235_p12 }
  0x21   : > { %p2238_p3 = pneg %p2237_p0 }
  0x23   : > { %p2243_p7 = pnand %p2241_p5, %p2238_p3 }
  0x25   : > { %2246 = shalt.err (!%p2243_p7)
}
  0x26   : > { %s2247_s10 = scalar_lea.vmem %s2552_s11, 24576  ;;  %p2255_p2 = scmp.lt.s32.totalorder %s2552_s11, %s2552_s11 }
  0x27   : > { %p2248_p9 = scmp.ne.s32.totalorder %s2552_s11, %s2247_s10  ;;  %p2256_p6 = scmp.lt.s32.totalorder %s2247_s10, %s2247_s10 }
  0x29   : > { %p2250_p10 = pnand %p2248_p9, %p2575_p13  ;;  %p2257_p12 = por %p2256_p6, %p2255_p2 }
  0x2b   : > { %p2251_p1 = pneg %p2250_p10 }
  0x2d   : > { %p2258_p0 = pnand %p2257_p12, %p2251_p1 }
  0x2f   : > { %2261 = shalt.err (!%p2258_p0)
}
  0x30   : > { %s2461_s13 = smov 256   ;;  %s2462_s15 = smov 16  }
  0x31   : > { %2169 = dma.hbm_to_vmem [thread:$0]  (!%p2559_p11), %s2846_s2, 24576, %s2552_s11, [#allocation6], %s2461_s13, %s2461_s13, %s2462_s15  }
  0x32   : > { %s2262_s21 = scalar_lea.hbm %s2829_s3, 32768 }
  0x33   : > { %p2263_p2 = scmp.ne.s32.totalorder %s2829_s3, %s2262_s21  ;;  %p2269_p10 = scmp.lt.u32.totalorder %s2262_s21, %s2829_s3 }
  0x35   : > { %p2265_p1 = pnand %p2263_p2, %p2575_p13 }
  0x37   : > { %p2266_p6 = pneg %p2265_p1 }
  0x39   : > { %p2271_p3 = pnand %p2269_p10, %p2266_p6 }
  0x3b   : > { %2274 = shalt.err (!%p2271_p3)
}
  0x3c   : > { %s2275_s11 = scalar_lea.vmem %s2563_s14, 32768  ;;  %p2283_p12 = scmp.lt.s32.totalorder %s2563_s14, %s2563_s14 }
  0x3d   : > { %p2276_p5 = scmp.ne.s32.totalorder %s2563_s14, %s2275_s11  ;;  %p2284_p0 = scmp.lt.s32.totalorder %s2275_s11, %s2275_s11 }
  0x3f   : > { %p2278_p7 = pnand %p2276_p5, %p2575_p13  ;;  %p2285_p2 = por %p2284_p0, %p2283_p12 }
  0x41   : > { %p2279_p9 = pneg %p2278_p7 }
  0x43   : > { %p2286_p1 = pnand %p2285_p2, %p2279_p9 }
  0x45   : > { %2289 = shalt.err (!%p2286_p1)
}
  0x46   : > { %2172 = dma.hbm_to_vmem [thread:$0]  (!%p2559_p11), %s2829_s3, 32768, %s2563_s14, [#allocation9], %s2461_s13, %s2461_s13, %s2462_s15  }
  0x47   : > { %s2290_s20 = scalar_lea.hbm %s2831_s5, 4096 }
  0x48   : > { %p2291_p6 = scmp.ne.s32.totalorder %s2831_s5, %s2290_s20  ;;  %p2297_p5 = scmp.lt.u32.totalorder %s2290_s20, %s2831_s5 }
  0x4a   : > { %p2293_p10 = pnand %p2291_p6, %p2575_p13 }
  0x4c   : > { %p2294_p3 = pneg %p2293_p10 }
  0x4e   : > { %p2299_p7 = pnand %p2297_p5, %p2294_p3 }
  0x50   : > { %2302 = shalt.err (!%p2299_p7)
}
  0x51   : > { %s2303_s11 = scalar_lea.vmem %s257_s16, 4096  ;;  %p2311_p2 = scmp.lt.s32.totalorder %s257_s16, %s257_s16 }
  0x52   : > { %p2304_p9 = scmp.ne.s32.totalorder %s257_s16, %s2303_s11  ;;  %p2312_p1 = scmp.lt.s32.totalorder %s2303_s11, %s2303_s11 }
  0x54   : > { %p2306_p12 = pnand %p2304_p9, %p2575_p13  ;;  %p2313_p4 = por %p2312_p1, %p2311_p2 }
  0x56   : > { %p2307_p0 = pneg %p2306_p12 }
  0x58   : > { %p2314_p8 = pnand %p2313_p4, %p2307_p0 }
  0x5a   : > { %2317 = shalt.err (!%p2314_p8)
}
  0x5b   : > { %s2463_s14 = smov 128   ;;  %s2464_s22 = smov 8  }
  0x5c   : > { %2175 = dma.hbm_to_vmem [thread:$0]  (!%p2559_p11), %s2831_s5, 4096, %s257_s16, [#allocation9], %s2463_s14, %s2463_s14, %s2464_s22  }
  0x5d   : > { %s2639_s8 = sadd.s32 1, %s2456_s27   ;;  %s34_s18 = sadd.s32 1, %s2452_s26 }
  0x5e   : > { %s31_s17 = ssub.s32 %s2456_s27, %s2639_s8  ;;  %p41_p8 = scmp.ne.s32.totalorder %s2452_s26, %s2448_s25 }
  0x5f   : > { %p32_p4 = scmp.eq.s32.totalorder %s31_s17, 0  ;;  %p42_p13 = scmp.eq.s32.totalorder %s2456_s27, 0 }
  0x60   : > { %p2190_p6 = scmp.lt.s32.totalorder %s2456_s27, 2  ;;  %p2848_p3 = scmp.eq.s32.totalorder %s2529_s28, 1 }
  0x61   : > { %s2649_s19 = scalar_select %p32_p4, %s2452_s26, %s34_s18  }
  0x62   : > { %p43_p10 = por %p42_p13, %p41_p8  ;;  %p2653_p5 = por %p2848_p3, %p41_p8 }
  0x63   : > { %s2658_s20 = sand.u32 1, %s2452_s26   ;;  %s2146_s16 = smul.u32 768, %s2456_s27 }
  0x64   : > { %s2849_s12 = scalar_select %p2653_p5, 1, 0 }
  0x65   : > { %s2145_s21 = smul.u32 48, %s2658_s20  ;;  %s2850_s0 = sld [smem:[#allocation18_spill]] }
  0x66   : > { %p2667_p11 = pnand %p2190_p6, %p43_p10  ;;  %s292_s14 = sand.u32 1, %s2456_s27  }
  0x67   : > { %s277_s22 = scalar_lea.vmem [#allocation2], %s2145_s21  ;;  %s274_s15 = scalar_lea.sflag [#allocation3], %s2658_s20 }
  0x68   : > { %s285_s13 = sshll.u32 %s277_s22, 4  ;;  %p2320_p9 = pneg %p2667_p11  ;;  %s2672_s13 = int_to_ptr.vmem [resolvable:$true] %s285_s13 }
  0x6b   : > { %s2665_s10 = scalar_lea.hbm %s2850_s0, %s2146_s16  ;;  %s2323_s23 = scalar_lea.hbm %s2850_s0, 1536 }
  0x6c   : > { %s2318_s17 = scalar_lea.hbm %s2665_s10, 768  ;;  %p2324_p2 = scmp.lt.u32.totalorder %s2665_s10, %s2850_s0 }
  0x6d   : > { %p2319_p7 = scmp.ne.s32.totalorder %s2665_s10, %s2318_s17  ;;  %p2325_p1 = scmp.lt.u32.totalorder %s2323_s23, %s2318_s17 }
  0x6e   : > { %p2327_p8 = scmp.lt.u32.totalorder %s2318_s17, %s2665_s10 }
  0x6f   : > { %p2321_p12 = pnand %p2320_p9, %p2319_p7  ;;  %p2326_p4 = por %p2325_p1, %p2324_p2 }
  0x71   : > { %p2322_p0 = pneg %p2321_p12  ;;  %p2328_p13 = por %p2327_p8, %p2326_p4 }
  0x73   : > { %p2329_p6 = pnand %p2328_p13, %p2322_p0 }
  0x75   : > { %2332 = shalt.err (!%p2329_p6)
}
  0x76   : > { %s2333_s21 = scalar_lea.vmem %s2672_s13, 768  ;;  %s2465_s22 = smov [#allocation2]  }
  0x77   : > { %p2334_p10 = scmp.ne.s32.totalorder %s2672_s13, %s2333_s21  ;;  %s2338_s18 = sshll.u32 %s2465_s22, 4  ;;  %s2339_s18 = int_to_ptr.vmem [resolvable:$false] %s2338_s18 }
  0x78   : > { %s2340_s2 = scalar_lea.vmem %s2339_s18, 1536  ;;  %p2341_p12 = scmp.lt.s32.totalorder %s2672_s13, %s2339_s18 }
  0x79   : > { %p2336_p3 = pnand %p2334_p10, %p2320_p9  ;;  %p2342_p2 = scmp.lt.s32.totalorder %s2340_s2, %s2333_s21 }
  0x7b   : > { %p2337_p7 = pneg %p2336_p3  ;;  %p2343_p1 = por %p2342_p2, %p2341_p12 }
  0x7d   : > { %p2344_p4 = pnand %p2343_p1, %p2337_p7 }
  0x7f   : > { %2347 = shalt.err (!%p2344_p4)
}
  0x80   : > { %2179 = dma.hbm_to_vmem [thread:$0]  (!%p2667_p11), %s2665_s10, 768, %s2672_s13, %s274_s15  }
  0x81   : > { %s1603_s17 = sshll.u32 %s2658_s20, 6  ;;  %s1617_s16 = sshll.u32 %s2456_s27, 10 }
  0x82   : > { %s2705_s22 = scalar_lea.hbm %s2827_s1, %s1617_s16  ;;  %s296_s21 = scalar_lea.vmem [#allocation5], %s1603_s17 }
  0x83   : > { %s304_s18 = sshll.u32 %s296_s21, 4  ;;  %s293_s2 = scalar_lea.sflag [#allocation6], %s292_s14  ;;  %s305_s18 = int_to_ptr.vmem [resolvable:$true] %s304_s18 }
  0x84   : > { %s2348_s0 = scalar_lea.hbm %s2705_s22, 1024  ;;  %s2353_s13 = scalar_lea.hbm %s2827_s1, 2048 }
  0x85   : > { %p2349_p0 = scmp.ne.s32.totalorder %s2705_s22, %s2348_s0  ;;  %p2354_p6 = scmp.lt.u32.totalorder %s2705_s22, %s2827_s1 }
  0x86   : > { %p2355_p10 = scmp.lt.u32.totalorder %s2353_s13, %s2348_s0  ;;  %p2357_p7 = scmp.lt.u32.totalorder %s2348_s0, %s2705_s22 }
  0x87   : > { %p2351_p8 = pnand %p2349_p0, %p2320_p9 }
  0x88   : > { %p2356_p3 = por %p2355_p10, %p2354_p6 }
  0x89   : > { %p2352_p13 = pneg %p2351_p8 }
  0x8a   : > { %p2358_p12 = por %p2357_p7, %p2356_p3 }
  0x8c   : > { %p2359_p2 = pnand %p2358_p12, %p2352_p13 }
  0x8e   : > { %2362 = shalt.err (!%p2359_p2)
}
  0x8f   : > { %s2363_s14 = scalar_lea.vmem %s305_s18, 1024  ;;  %s2466_s17 = smov [#allocation5]  }
  0x90   : > { %p2364_p1 = scmp.ne.s32.totalorder %s305_s18, %s2363_s14  ;;  %s2368_s23 = sshll.u32 %s2466_s17, 4  ;;  %s2369_s23 = int_to_ptr.vmem [resolvable:$false] %s2368_s23 }
  0x91   : > { %s2370_s29 = scalar_lea.vmem %s2369_s23, 2048  ;;  %p2371_p8 = scmp.lt.s32.totalorder %s305_s18, %s2369_s23 }
  0x92   : > { %p2366_p4 = pnand %p2364_p1, %p2320_p9  ;;  %p2372_p5 = scmp.lt.s32.totalorder %s2370_s29, %s2363_s14 }
  0x94   : > { %p2367_p0 = pneg %p2366_p4  ;;  %p2373_p6 = por %p2372_p5, %p2371_p8 }
  0x96   : > { %p2374_p10 = pnand %p2373_p6, %p2367_p0 }
  0x98   : > { %2377 = shalt.err (!%p2374_p10)
}
  0x99   : > { %2182 = dma.hbm_to_vmem [thread:$0]  (!%p2667_p11), %s2705_s22, 1024, %s305_s18, %s293_s2  }
  0x9a   : > { %p2852_p13 = scmp.ne.s32.totalorder %s2844_s9, 0 }
  0x9b   : > { %s2731_s0 = sand.u32 (!%p2852_p13), 1, %s2448_s25   ;;  %p2853_p5 = scmp.ne.s32.totalorder (!%p2852_p13), %s2841_s30, 0 }
  0x9c   : > { %313 = sbr.rel (%p2852_p13) target bundleno = 886 (0x376), region = 48  ;;  %s316_s20 = scalar_lea.sflag (!%p2852_p13), [#allocation3], %s2731_s0 }
  0x9d   : > { %s2147_s21 = smul.u32 (!%p2852_p13), 48, %s2731_s0 }
  0x9f   : > { %s2735_s10 = scalar_lea.vmem (!%p2852_p13), [#allocation2], %s2147_s21 }
  0xa3   : > { %2423 = dma.done.wait (%p2853_p5), %s316_s20, 768  }
  0xa4   : > { %2425 = vsyncadd (%p2853_p5), %s316_s20, 4294966528  ;;  %s324_s9 = sand.u32 1, %s2529_s28   ;;  %s1607_s11 = sshll.u32 %s2731_s0, 6 }
  0xa5   : > { %s325_s22 = scalar_lea.sflag [#allocation6], %s324_s9  ;;  %s2743_s18 = scalar_lea.vmem [#allocation5], %s1607_s11 }
  0xa6   : > { %2427 = dma.done.wait (%p2853_p5), %s325_s22, 1024  }
  0xa7   : > { %2429 = vsyncadd (%p2853_p5), %s325_s22, 4294966272  ;;  %p2854_p11 = scmp.eq.s32.totalorder %s2529_s28, 0 }
  0xa9   : > { %2431 = dma.done.wait (%p2854_p11), [#allocation6], 24576   ;;  %p2855_p9 = pmov %p2854_p11 }
  0xab   : > { %2433 = vsyncadd (%p2855_p9), [#allocation6], 4294942720  ;;  %p2856_p3 = pmov %p2855_p9 }
  0xad   : > { %2435 = dma.done.wait (%p2856_p3), [#allocation9], 36864   ;;  %p2857_p7 = pmov %p2856_p3 }
  0xae   : > { %v583_v0 = vld [vmem:[#allocation8 + $0x8] sm:$0xff]  ;;  %v585_v1 = vld [vmem:[#allocation8 + $0x18] sm:$0xff]  ;;  %v582_v5 = vld [vmem:[#allocation8] sm:$0xff]  ;;  %s1611_s13 = sshll.u32 %s2731_s0, 3  ;;  %s1614_s14 = sshll.u32 %s2529_s28, 7 }
  0xaf   : > { %2437 = vsyncadd (%p2857_p7), [#allocation9], 4294930432  ;;  %v775_v2 = vld [vmem:[#allocation8 + $0x608] sm:$0xff]  ;;  %v1653_v3 = vpack.c.bf16 %v585_v1, %v583_v0  ;;  %v777_v4 = vld [vmem:[#allocation8 + $0x618] sm:$0xff]  ;;  %s375_s17 = scalar_lea.vmem [#allocation11], %s1611_s13  ;;  %s2782_s20 = scalar_lea.hbm %s2833_s7, %s1614_s14 }
  0xb0   : > { %v584_v6 = vld [vmem:[#allocation8 + $0x10] sm:$0xff]  ;;  %v1845_v7 = vpack.c.bf16 %v777_v4, %v775_v2  ;;  %v774_v9 = vld [vmem:[#allocation8 + $0x600] sm:$0xff]  ;;  %v587_v11 = vld [vmem:[#allocation8 + $0x28] sm:$0xff]  ;;  %s1475_s23 = sshll.u32 %s375_s17, 4  ;;  %p2858_p2 = scmp.ne.s32.totalorder %s2849_s12, 0  ;;  %s2784_s23 = int_to_ptr.vmem [resolvable:$true] %s1475_s23 }
  0xb1   : > { %v1655_v8 = vpack.c.bf16 %v584_v6, %v582_v5  ;;  %v776_v10 = vld [vmem:[#allocation8 + $0x610] sm:$0xff]  ;;  %1654 = vmatprep.subr.bf16.mxu1 %v1653_v3  ;;  %v589_v13 = vld [vmem:[#allocation8 + $0x38] sm:$0xff]  ;;  %v779_v14 = vld [vmem:[#allocation8 + $0x628] sm:$0xff]  ;;  %s2378_s9 = scalar_lea.vmem %s2784_s23, 128  ;;  %s2467_s28 = smov [#allocation11]  }
  0xb2   : > { %v1847_v12 = vpack.c.bf16 %v776_v10, %v774_v9  ;;  %v781_v15 = vld [vmem:[#allocation8 + $0x638] sm:$0xff]  ;;  %1846 = vmatprep.subr.bf16.mxu0 %v1845_v7  ;;  %v1657_v16 = vpack.c.bf16 %v589_v13, %v587_v11  ;;  %v586_v18 = vld [vmem:[#allocation8 + $0x20] sm:$0xff]  ;;  %v588_v19 = vld [vmem:[#allocation8 + $0x30] sm:$0xff]  ;;  %p2379_p12 = scmp.ne.s32.totalorder %s2784_s23, %s2378_s9  ;;  %s2382_s11 = sshll.u32 %s2467_s28, 4  ;;  %s2383_s11 = int_to_ptr.vmem [resolvable:$false] %s2382_s11 }
  0xb3   : > { %1656 = vmatpush1.bf16.msra.mxu1 %v1655_v8  ;;  %v1849_v17 = vpack.c.bf16 %v781_v15, %v779_v14  ;;  %v778_v20 = vld [vmem:[#allocation8 + $0x620] sm:$0xff]  ;;  %v1659_v21 = vpack.c.bf16 %v588_v19, %v586_v18  ;;  %v780_v22 = vld [vmem:[#allocation8 + $0x630] sm:$0xff]  ;;  %v591_v23 = vld [vmem:[#allocation8 + $0x48] sm:$0xff]  ;;  %s2384_s22 = scalar_lea.vmem %s2383_s11, 256  ;;  %p2385_p0 = scmp.lt.s32.totalorder %s2784_s23, %s2383_s11 }
  0xb4   : > { %1848 = vmatpush1.bf16.msra.mxu0 %v1847_v12  ;;  %v593_v24 = vld [vmem:[#allocation8 + $0x58] sm:$0xff]  ;;  %1658 = vmatprep.subr.bf16.mxu1 %v1657_v16  ;;  %v1851_v25 = vpack.c.bf16 %v780_v22, %v778_v20  ;;  %v783_v27 = vld [vmem:[#allocation8 + $0x648] sm:$0xff]  ;;  %v590_v29 = vld [vmem:[#allocation8 + $0x40] sm:$0xff]  ;;  %p2380_p1 = pnand %p2379_p12, %p2858_p2  ;;  %p2386_p8 = scmp.lt.s32.totalorder %s2384_s22, %s2378_s9 }
  0xb5   : > { %1850 = vmatprep.subr.bf16.mxu0 %v1849_v17  ;;  %v1661_v26 = vpack.c.bf16 %v593_v24, %v591_v23  ;;  %v785_v28 = vld [vmem:[#allocation8 + $0x658] sm:$0xff]  ;;  %v592_v31 = vld [vmem:[#allocation8 + $0x50] sm:$0xff]  ;;  %v782_v32 = vld [vmem:[#allocation8 + $0x640] sm:$0xff] }
  0xb6   : > { %v1853_v30 = vpack.c.bf16 %v785_v28, %v783_v27  ;;  %v784_v33 = vld [vmem:[#allocation8 + $0x650] sm:$0xff]  ;;  %v1663_v34 = vpack.c.bf16 %v592_v31, %v590_v29  ;;  %v595_v35 = vld [vmem:[#allocation8 + $0x68] sm:$0xff]  ;;  %v597_v36 = vld [vmem:[#allocation8 + $0x78] sm:$0xff]  ;;  %p2381_p4 = pneg %p2380_p1  ;;  %p2387_p6 = por %p2386_p8, %p2385_p0 }
  0xb7   : > { %1660 = vmatpush1.bf16.msra.mxu1 %v1659_v21  ;;  %v787_v37 = vld [vmem:[#allocation8 + $0x668] sm:$0xff]  ;;  %v1855_v38 = vpack.c.bf16 %v784_v33, %v782_v32  ;;  %v1665_v39 = vpack.c.bf16 %v597_v36, %v595_v35  ;;  %v789_v40 = vld [vmem:[#allocation8 + $0x678] sm:$0xff]  ;;  %v594_v41 = vld [vmem:[#allocation8 + $0x60] sm:$0xff] }
  0xb8   : > { %1852 = vmatpush1.bf16.msra.mxu0 %v1851_v25  ;;  %1662 = vmatprep.subr.bf16.mxu1 %v1661_v26  ;;  %v596_v42 = vld [vmem:[#allocation8 + $0x70] sm:$0xff]  ;;  %v1857_v43 = vpack.c.bf16 %v789_v40, %v787_v37  ;;  %v786_v44 = vld [vmem:[#allocation8 + $0x660] sm:$0xff]  ;;  %v599_v46 = vld [vmem:[#allocation8 + $0x88] sm:$0xff]  ;;  %p2388_p10 = pnand %p2387_p6, %p2381_p4 }
  0xb9   : > { %1854 = vmatprep.subr.bf16.mxu0 %v1853_v30  ;;  %v788_v45 = vld [vmem:[#allocation8 + $0x670] sm:$0xff]  ;;  %v601_v47 = vld [vmem:[#allocation8 + $0x98] sm:$0xff]  ;;  %v791_v48 = vld [vmem:[#allocation8 + $0x688] sm:$0xff]  ;;  %v1667_v50 = vpack.c.bf16 %v596_v42, %v594_v41 }
  0xba   : > { %v793_v49 = vld [vmem:[#allocation8 + $0x698] sm:$0xff]  ;;  %v1859_v51 = vpack.c.bf16 %v788_v45, %v786_v44  ;;  %v1669_v52 = vpack.c.bf16 %v601_v47, %v599_v46  ;;  %v598_v53 = vld [vmem:[#allocation8 + $0x80] sm:$0xff]  ;;  %v600_v54 = vld [vmem:[#allocation8 + $0x90] sm:$0xff] }
  0xbb   : > { %1664 = vmatpush1.bf16.msra.mxu1 %v1663_v34  ;;  %v790_v55 = vld [vmem:[#allocation8 + $0x680] sm:$0xff]  ;;  %v1861_v56 = vpack.c.bf16 %v793_v49, %v791_v48  ;;  %v792_v57 = vld [vmem:[#allocation8 + $0x690] sm:$0xff]  ;;  %v603_v58 = vld [vmem:[#allocation8 + $0xa8] sm:$0xff]  ;;  %v1671_v62 = vpack.c.bf16 %v600_v54, %v598_v53 }
  0xbc   : > { %1856 = vmatpush1.bf16.msra.mxu0 %v1855_v38  ;;  %1666 = vmatprep.subr.bf16.mxu1 %v1665_v39  ;;  %v605_v59 = vld [vmem:[#allocation8 + $0xb8] sm:$0xff]  ;;  %v795_v60 = vld [vmem:[#allocation8 + $0x6a8] sm:$0xff]  ;;  %v1863_v63 = vpack.c.bf16 %v792_v57, %v790_v55  ;;  %v602_v1 = vld [vmem:[#allocation8 + $0xa0] sm:$0xff] }
  0xbd   : > { %1858 = vmatprep.subr.bf16.mxu0 %v1857_v43  ;;  %v797_v61 = vld [vmem:[#allocation8 + $0x6b8] sm:$0xff]  ;;  %v1673_v0 = vpack.c.bf16 %v605_v59, %v603_v58  ;;  %v604_v2 = vld [vmem:[#allocation8 + $0xb0] sm:$0xff]  ;;  %v794_v3 = vld [vmem:[#allocation8 + $0x6a0] sm:$0xff] }
  0xbe   : > { %v1865_v4 = vpack.c.bf16 %v797_v61, %v795_v60  ;;  %v796_v5 = vld [vmem:[#allocation8 + $0x6b0] sm:$0xff]  ;;  %v607_v6 = vld [vmem:[#allocation8 + $0xc8] sm:$0xff]  ;;  %v609_v7 = vld [vmem:[#allocation8 + $0xd8] sm:$0xff]  ;;  %v1675_v10 = vpack.c.bf16 %v604_v2, %v602_v1 }
  0xbf   : > { %1668 = vmatpush1.bf16.msra.mxu1 %v1667_v50  ;;  %v799_v8 = vld [vmem:[#allocation8 + $0x6c8] sm:$0xff]  ;;  %v801_v9 = vld [vmem:[#allocation8 + $0x6d8] sm:$0xff]  ;;  %v1867_v11 = vpack.c.bf16 %v796_v5, %v794_v3  ;;  %v1677_v12 = vpack.c.bf16 %v609_v7, %v607_v6  ;;  %v606_v13 = vld [vmem:[#allocation8 + $0xc0] sm:$0xff] }
  0xc0   : > { %1860 = vmatpush1.bf16.msra.mxu0 %v1859_v51  ;;  %1670 = vmatprep.subr.bf16.mxu1 %v1669_v52  ;;  %v608_v14 = vld [vmem:[#allocation8 + $0xd0] sm:$0xff]  ;;  %v798_v15 = vld [vmem:[#allocation8 + $0x6c0] sm:$0xff]  ;;  %v1869_v16 = vpack.c.bf16 %v801_v9, %v799_v8  ;;  %v611_v18 = vld [vmem:[#allocation8 + $0xe8] sm:$0xff] }
  0xc1   : > { %1862 = vmatprep.subr.bf16.mxu0 %v1861_v56  ;;  %v800_v17 = vld [vmem:[#allocation8 + $0x6d0] sm:$0xff]  ;;  %v613_v19 = vld [vmem:[#allocation8 + $0xf8] sm:$0xff]  ;;  %v803_v20 = vld [vmem:[#allocation8 + $0x6e8] sm:$0xff]  ;;  %v1679_v22 = vpack.c.bf16 %v608_v14, %v606_v13 }
  0xc2   : > { %v805_v21 = vld [vmem:[#allocation8 + $0x6f8] sm:$0xff]  ;;  %v1871_v23 = vpack.c.bf16 %v800_v17, %v798_v15  ;;  %v1681_v24 = vpack.c.bf16 %v613_v19, %v611_v18  ;;  %v610_v25 = vld [vmem:[#allocation8 + $0xe0] sm:$0xff]  ;;  %v612_v26 = vld [vmem:[#allocation8 + $0xf0] sm:$0xff] }
  0xc3   : > { %1672 = vmatpush1.bf16.msra.mxu1 %v1671_v62  ;;  %v802_v27 = vld [vmem:[#allocation8 + $0x6e0] sm:$0xff]  ;;  %v1873_v28 = vpack.c.bf16 %v805_v21, %v803_v20  ;;  %v804_v29 = vld [vmem:[#allocation8 + $0x6f0] sm:$0xff]  ;;  %v615_v30 = vld [vmem:[#allocation8 + $0x108] sm:$0xff]  ;;  %v1683_v34 = vpack.c.bf16 %v612_v26, %v610_v25 }
  0xc4   : > { %1864 = vmatpush1.bf16.msra.mxu0 %v1863_v63  ;;  %1674 = vmatprep.subr.bf16.mxu1 %v1673_v0  ;;  %v617_v31 = vld [vmem:[#allocation8 + $0x118] sm:$0xff]  ;;  %v807_v32 = vld [vmem:[#allocation8 + $0x708] sm:$0xff]  ;;  %v1875_v35 = vpack.c.bf16 %v804_v29, %v802_v27  ;;  %v614_v37 = vld [vmem:[#allocation8 + $0x100] sm:$0xff] }
  0xc5   : > { %1866 = vmatprep.subr.bf16.mxu0 %v1865_v4  ;;  %v809_v33 = vld [vmem:[#allocation8 + $0x718] sm:$0xff]  ;;  %v1685_v36 = vpack.c.bf16 %v617_v31, %v615_v30  ;;  %v616_v38 = vld [vmem:[#allocation8 + $0x110] sm:$0xff]  ;;  %v806_v39 = vld [vmem:[#allocation8 + $0x700] sm:$0xff] }
  0xc6   : > { %v1877_v40 = vpack.c.bf16 %v809_v33, %v807_v32  ;;  %v808_v41 = vld [vmem:[#allocation8 + $0x710] sm:$0xff]  ;;  %v619_v42 = vld [vmem:[#allocation8 + $0x128] sm:$0xff]  ;;  %v621_v43 = vld [vmem:[#allocation8 + $0x138] sm:$0xff]  ;;  %v1687_v46 = vpack.c.bf16 %v616_v38, %v614_v37 }
  0xc7   : > { %1676 = vmatpush1.bf16.msra.mxu1 %v1675_v10  ;;  %v811_v44 = vld [vmem:[#allocation8 + $0x728] sm:$0xff]  ;;  %v813_v45 = vld [vmem:[#allocation8 + $0x738] sm:$0xff]  ;;  %v1879_v47 = vpack.c.bf16 %v808_v41, %v806_v39  ;;  %v1689_v48 = vpack.c.bf16 %v621_v43, %v619_v42  ;;  %v618_v49 = vld [vmem:[#allocation8 + $0x120] sm:$0xff] }
  0xc8   : > { %1868 = vmatpush1.bf16.msra.mxu0 %v1867_v11  ;;  %1678 = vmatprep.subr.bf16.mxu1 %v1677_v12  ;;  %v620_v50 = vld [vmem:[#allocation8 + $0x130] sm:$0xff]  ;;  %v810_v51 = vld [vmem:[#allocation8 + $0x720] sm:$0xff]  ;;  %v1881_v52 = vpack.c.bf16 %v813_v45, %v811_v44  ;;  %v623_v54 = vld [vmem:[#allocation8 + $0x148] sm:$0xff] }
  0xc9   : > { %1870 = vmatprep.subr.bf16.mxu0 %v1869_v16  ;;  %v812_v53 = vld [vmem:[#allocation8 + $0x730] sm:$0xff]  ;;  %v625_v55 = vld [vmem:[#allocation8 + $0x158] sm:$0xff]  ;;  %v815_v56 = vld [vmem:[#allocation8 + $0x748] sm:$0xff]  ;;  %v1691_v58 = vpack.c.bf16 %v620_v50, %v618_v49 }
  0xca   : > { %v817_v57 = vld [vmem:[#allocation8 + $0x758] sm:$0xff]  ;;  %v1883_v59 = vpack.c.bf16 %v812_v53, %v810_v51  ;;  %v1693_v60 = vpack.c.bf16 %v625_v55, %v623_v54  ;;  %v622_v61 = vld [vmem:[#allocation8 + $0x140] sm:$0xff]  ;;  %v624_v62 = vld [vmem:[#allocation8 + $0x150] sm:$0xff] }
  0xcb   : > { %1680 = vmatpush1.bf16.msra.mxu1 %v1679_v22  ;;  %v814_v63 = vld [vmem:[#allocation8 + $0x740] sm:$0xff]  ;;  %v1885_v0 = vpack.c.bf16 %v817_v57, %v815_v56  ;;  %v816_v1 = vld [vmem:[#allocation8 + $0x750] sm:$0xff]  ;;  %v627_v2 = vld [vmem:[#allocation8 + $0x168] sm:$0xff]  ;;  %v1695_v6 = vpack.c.bf16 %v624_v62, %v622_v61 }
  0xcc   : > { %1872 = vmatpush1.bf16.msra.mxu0 %v1871_v23  ;;  %1682 = vmatprep.subr.bf16.mxu1 %v1681_v24  ;;  %v629_v3 = vld [vmem:[#allocation8 + $0x178] sm:$0xff]  ;;  %v819_v4 = vld [vmem:[#allocation8 + $0x768] sm:$0xff]  ;;  %v626_v7 = vld [vmem:[#allocation8 + $0x160] sm:$0xff]  ;;  %v1887_v8 = vpack.c.bf16 %v816_v1, %v814_v63 }
  0xcd   : > { %1874 = vmatprep.subr.bf16.mxu0 %v1873_v28  ;;  %v821_v5 = vld [vmem:[#allocation8 + $0x778] sm:$0xff]  ;;  %v1697_v9 = vpack.c.bf16 %v629_v3, %v627_v2  ;;  %v628_v10 = vld [vmem:[#allocation8 + $0x170] sm:$0xff]  ;;  %v818_v11 = vld [vmem:[#allocation8 + $0x760] sm:$0xff] }
  0xce   : > { %v820_v12 = vld [vmem:[#allocation8 + $0x770] sm:$0xff]  ;;  %v1889_v13 = vpack.c.bf16 %v821_v5, %v819_v4  ;;  %v631_v14 = vld [vmem:[#allocation8 + $0x188] sm:$0xff]  ;;  %v633_v15 = vld [vmem:[#allocation8 + $0x198] sm:$0xff]  ;;  %v1699_v20 = vpack.c.bf16 %v628_v10, %v626_v7 }
  0xcf   : > { %1684 = vmatpush1.bf16.msra.mxu1 %v1683_v34  ;;  %v575_v16 = vld [vmem:[%s2743_s18 + $0x8] sm:$0xff]  ;;  %v825_v18 = vld [vmem:[#allocation8 + $0x798] sm:$0xff]  ;;  %v1891_v21 = vpack.c.bf16 %v820_v12, %v818_v11  ;;  %v1701_v22 = vpack.c.bf16 %v633_v15, %v631_v14  ;;  %v630_v23 = vld [vmem:[#allocation8 + $0x180] sm:$0xff] }
  0xd0   : > { %1876 = vmatpush1.bf16.msra.mxu0 %v1875_v35  ;;  %1686 = vmatprep.subr.bf16.mxu1 %v1685_v36  ;;  %v823_v17 = vld [vmem:[#allocation8 + $0x788] sm:$0xff]  ;;  %v581_v19 = vld [vmem:[%s2743_s18 + $0x38] sm:$0xff]  ;;  %v632_v24 = vld [vmem:[#allocation8 + $0x190] sm:$0xff] }
  0xd1   : > { %1878 = vmatprep.subr.bf16.mxu0 %v1877_v40  ;;  %902 = vmatprep.mubr.f32.mxu1 %v575_v16  ;;  %v822_v25 = vld [vmem:[#allocation8 + $0x780] sm:$0xff]  ;;  %v1893_v26 = vpack.c.bf16 %v825_v18, %v823_v17  ;;  %v824_v27 = vld [vmem:[#allocation8 + $0x790] sm:$0xff]  ;;  %v635_v28 = vld [vmem:[#allocation8 + $0x1a8] sm:$0xff]  ;;  %v1703_v32 = vpack.c.bf16 %v632_v24, %v630_v23 }
  0xd2   : > { %1115 = vmatprep.mubr.f32.mxu0 %v581_v19  ;;  %v637_v29 = vld [vmem:[#allocation8 + $0x1b8] sm:$0xff]  ;;  %v827_v30 = vld [vmem:[#allocation8 + $0x7a8] sm:$0xff]  ;;  %v1895_v33 = vpack.c.bf16 %v824_v27, %v822_v25  ;;  %v634_v35 = vld [vmem:[#allocation8 + $0x1a0] sm:$0xff] }
  0xd3   : > { %1688 = vmatpush1.bf16.msra.mxu1 %v1687_v46  ;;  %v829_v31 = vld [vmem:[#allocation8 + $0x7b8] sm:$0xff]  ;;  %v1705_v34 = vpack.c.bf16 %v637_v29, %v635_v28  ;;  %v636_v36 = vld [vmem:[#allocation8 + $0x1b0] sm:$0xff]  ;;  %v826_v37 = vld [vmem:[#allocation8 + $0x7a0] sm:$0xff] }
  0xd4   : > { %1880 = vmatpush1.bf16.msra.mxu0 %v1879_v47  ;;  %1690 = vmatprep.subr.bf16.mxu1 %v1689_v48  ;;  %v1897_v38 = vpack.c.bf16 %v829_v31, %v827_v30  ;;  %v828_v39 = vld [vmem:[#allocation8 + $0x7b0] sm:$0xff]  ;;  %v639_v40 = vld [vmem:[#allocation8 + $0x1c8] sm:$0xff]  ;;  %v641_v41 = vld [vmem:[#allocation8 + $0x1d8] sm:$0xff]  ;;  %v1707_v44 = vpack.c.bf16 %v636_v36, %v634_v35 }
  0xd5   : > { %1882 = vmatprep.subr.bf16.mxu0 %v1881_v52  ;;  %v831_v42 = vld [vmem:[#allocation8 + $0x7c8] sm:$0xff]  ;;  %v833_v43 = vld [vmem:[#allocation8 + $0x7d8] sm:$0xff]  ;;  %v1899_v45 = vpack.c.bf16 %v828_v39, %v826_v37  ;;  %v1709_v46 = vpack.c.bf16 %v641_v41, %v639_v40  ;;  %v638_v47 = vld [vmem:[#allocation8 + $0x1c0] sm:$0xff] }
  0xd6   : > { %v640_v48 = vld [vmem:[#allocation8 + $0x1d0] sm:$0xff]  ;;  %v830_v49 = vld [vmem:[#allocation8 + $0x7c0] sm:$0xff]  ;;  %v1901_v50 = vpack.c.bf16 %v833_v43, %v831_v42  ;;  %v643_v52 = vld [vmem:[#allocation8 + $0x1e8] sm:$0xff] }
  0xd7   : > { %1692 = vmatpush1.bf16.msra.mxu1 %v1691_v58  ;;  %v832_v51 = vld [vmem:[#allocation8 + $0x7d0] sm:$0xff]  ;;  %v645_v53 = vld [vmem:[#allocation8 + $0x1f8] sm:$0xff]  ;;  %v835_v54 = vld [vmem:[#allocation8 + $0x7e8] sm:$0xff]  ;;  %v1711_v56 = vpack.c.bf16 %v640_v48, %v638_v47 }
  0xd8   : > { %1884 = vmatpush1.bf16.msra.mxu0 %v1883_v59  ;;  %1694 = vmatprep.subr.bf16.mxu1 %v1693_v60  ;;  %v837_v55 = vld [vmem:[#allocation8 + $0x7f8] sm:$0xff]  ;;  %v1903_v57 = vpack.c.bf16 %v832_v51, %v830_v49  ;;  %v1713_v58 = vpack.c.bf16 %v645_v53, %v643_v52  ;;  %v642_v59 = vld [vmem:[#allocation8 + $0x1e0] sm:$0xff]  ;;  %v644_v60 = vld [vmem:[#allocation8 + $0x1f0] sm:$0xff] }
  0xd9   : > { %1886 = vmatprep.subr.bf16.mxu0 %v1885_v0  ;;  %v834_v61 = vld [vmem:[#allocation8 + $0x7e0] sm:$0xff]  ;;  %v1905_v62 = vpack.c.bf16 %v837_v55, %v835_v54  ;;  %v836_v63 = vld [vmem:[#allocation8 + $0x7f0] sm:$0xff]  ;;  %v647_v0 = vld [vmem:[#allocation8 + $0x208] sm:$0xff]  ;;  %v1715_v4 = vpack.c.bf16 %v644_v60, %v642_v59 }
  0xda   : > { %v649_v1 = vld [vmem:[#allocation8 + $0x218] sm:$0xff]  ;;  %v383_v2 = vld [vmem:[#allocation7 + $0x8] sm:$0xff]  ;;  %v1907_v5 = vpack.c.bf16 %v836_v63, %v834_v61  ;;  %v646_v7 = vld [vmem:[#allocation8 + $0x200] sm:$0xff] }
  0xdb   : > { %1696 = vmatpush1.bf16.msra.mxu1 %v1695_v6  ;;  %v385_v3 = vld [vmem:[#allocation7 + $0x18] sm:$0xff]  ;;  %v1717_v6 = vpack.c.bf16 %v649_v1, %v647_v0  ;;  %v384_v11 = vld [vmem:[#allocation7 + $0x10] sm:$0xff]  ;;  %v651_v12 = vld [vmem:[#allocation8 + $0x228] sm:$0xff] }
  0xdc   : > { %1888 = vmatpush1.bf16.msra.mxu0 %v1887_v8  ;;  %1698 = vmatprep.subr.bf16.mxu1 %v1697_v9  ;;  %v648_v8 = vld [vmem:[#allocation8 + $0x210] sm:$0xff]  ;;  %v382_v9 = vld [vmem:[#allocation7] sm:$0xff]  ;;  %v1909_v10 = vpack.c.bf16 %v385_v3, %v383_v2  ;;  %v387_v14 = vld [vmem:[#allocation7 + $0x28] sm:$0xff] }
  0xdd   : > { %1890 = vmatprep.subr.bf16.mxu0 %v1889_v13  ;;  %v653_v13 = vld [vmem:[#allocation8 + $0x238] sm:$0xff]  ;;  %v574_v16 = vld [vmem:[%s2743_s18] sm:$0xff]  ;;  %v1719_v17 = vpack.c.bf16 %v648_v8, %v646_v7  ;;  %v580_v18 = vld [vmem:[%s2743_s18 + $0x30] sm:$0xff]  ;;  %v1911_v19 = vpack.c.bf16 %v384_v11, %v382_v9 }
  0xde   : > { %v389_v15 = vld [vmem:[#allocation7 + $0x38] sm:$0xff]  ;;  %v386_v23 = vld [vmem:[#allocation7 + $0x20] sm:$0xff]  ;;  %v388_v25 = vld [vmem:[#allocation7 + $0x30] sm:$0xff] }
  0xdf   : > { %1700 = vmatpush1.bf16.msra.mxu1 %v1699_v20  ;;  %v1721_v20 = vpack.c.bf16 %v653_v13, %v651_v12  ;;  %v1913_v24 = vpack.c.bf16 %v389_v15, %v387_v14  ;;  %v657_v27 = vld [vmem:[#allocation8 + $0x258] sm:$0xff]  ;;  %v391_v28 = vld [vmem:[#allocation7 + $0x48] sm:$0xff]  ;;  %v1915_v31 = vpack.c.bf16 %v388_v25, %v386_v23  ;;  %v390_v35 = vld [vmem:[#allocation7 + $0x40] sm:$0xff] }
  0xe0   : > { %1892 = vmatpush1.bf16.msra.mxu0 %v1891_v21  ;;  %1702 = vmatprep.subr.bf16.mxu1 %v1701_v22  ;;  %v650_v21 = vld [vmem:[#allocation8 + $0x220] sm:$0xff]  ;;  %v652_v22 = vld [vmem:[#allocation8 + $0x230] sm:$0xff]  ;;  %v393_v29 = vld [vmem:[#allocation7 + $0x58] sm:$0xff] }
  0xe1   : > { %1894 = vmatprep.subr.bf16.mxu0 %v1893_v26  ;;  %v655_v26 = vld [vmem:[#allocation8 + $0x248] sm:$0xff]  ;;  %v1723_v30 = vpack.c.bf16 %v652_v22, %v650_v21  ;;  %v1917_v36 = vpack.c.bf16 %v393_v29, %v391_v28  ;;  %v392_v37 = vld [vmem:[#allocation7 + $0x50] sm:$0xff]  ;;  %v661_v39 = vld [vmem:[#allocation8 + $0x278] sm:$0xff] }
  0xe2   : > { %v395_v40 = vld [vmem:[#allocation7 + $0x68] sm:$0xff]  ;;  %v397_v41 = vld [vmem:[#allocation7 + $0x78] sm:$0xff]  ;;  %v1919_v43 = vpack.c.bf16 %v392_v37, %v390_v35  ;;  %v394_v47 = vld [vmem:[#allocation7 + $0x60] sm:$0xff] }
  0xe3   : > { %1704 = vmatpush1.bf16.msra.mxu1 %v1703_v32  ;;  %v1725_v32 = vpack.c.bf16 %v657_v27, %v655_v26  ;;  %v1921_v48 = vpack.c.bf16 %v397_v41, %v395_v40  ;;  %v396_v49 = vld [vmem:[#allocation7 + $0x70] sm:$0xff]  ;;  %v665_v51 = vld [vmem:[#allocation8 + $0x298] sm:$0xff]  ;;  %v399_v52 = vld [vmem:[#allocation7 + $0x88] sm:$0xff] }
  0xe4   : > { %1896 = vmatpush1.bf16.msra.mxu0 %v1895_v33  ;;  %1706 = vmatprep.subr.bf16.mxu1 %v1705_v34  ;;  %v654_v33 = vld [vmem:[#allocation8 + $0x240] sm:$0xff]  ;;  %v656_v34 = vld [vmem:[#allocation8 + $0x250] sm:$0xff]  ;;  %v401_v53 = vld [vmem:[#allocation7 + $0x98] sm:$0xff]  ;;  %v1923_v55 = vpack.c.bf16 %v396_v49, %v394_v47 }
  0xe5   : > { %1898 = vmatprep.subr.bf16.mxu0 %v1897_v38  ;;  %v659_v38 = vld [vmem:[#allocation8 + $0x268] sm:$0xff]  ;;  %v1727_v42 = vpack.c.bf16 %v656_v34, %v654_v33  ;;  %v398_v59 = vld [vmem:[#allocation7 + $0x80] sm:$0xff]  ;;  %v1925_v60 = vpack.c.bf16 %v401_v53, %v399_v52  ;;  %v400_v61 = vld [vmem:[#allocation7 + $0x90] sm:$0xff] }
  0xe6   : > { %v669_v63 = vld [vmem:[#allocation8 + $0x2b8] sm:$0xff]  ;;  %v403_v0 = vld [vmem:[#allocation7 + $0xa8] sm:$0xff]  ;;  %v1927_v3 = vpack.c.bf16 %v400_v61, %v398_v59  ;;  %v402_v7 = vld [vmem:[#allocation7 + $0xa0] sm:$0xff] }
  0xe7   : > { %1708 = vmatpush1.bf16.msra.mxu1 %v1707_v44  ;;  %v1729_v44 = vpack.c.bf16 %v661_v39, %v659_v38  ;;  %v405_v1 = vld [vmem:[#allocation7 + $0xb8] sm:$0xff]  ;;  %v404_v9 = vld [vmem:[#allocation7 + $0xb0] sm:$0xff]  ;;  %v407_v12 = vld [vmem:[#allocation7 + $0xc8] sm:$0xff] }
  0xe8   : > { %1900 = vmatpush1.bf16.msra.mxu0 %v1899_v45  ;;  %1710 = vmatprep.subr.bf16.mxu1 %v1709_v46  ;;  %v658_v45 = vld [vmem:[#allocation8 + $0x260] sm:$0xff]  ;;  %v660_v46 = vld [vmem:[#allocation8 + $0x270] sm:$0xff]  ;;  %v1929_v8 = vpack.c.bf16 %v405_v1, %v403_v0  ;;  %v673_v11 = vld [vmem:[#allocation8 + $0x2d8] sm:$0xff] }
  0xe9   : > { %1902 = vmatprep.subr.bf16.mxu0 %v1901_v50  ;;  %v663_v50 = vld [vmem:[#allocation8 + $0x288] sm:$0xff]  ;;  %v1731_v54 = vpack.c.bf16 %v660_v46, %v658_v45  ;;  %v409_v13 = vld [vmem:[#allocation7 + $0xd8] sm:$0xff]  ;;  %v670_v15 = vld [vmem:[#allocation8 + $0x2c0] sm:$0xff] }
  0xea   : > { %v1933_v21 = vpack.c.bf16 %v409_v13, %v407_v12  ;;  %v675_v22 = vld [vmem:[#allocation8 + $0x2e8] sm:$0xff]  ;;  %v677_v23 = vld [vmem:[#allocation8 + $0x2f8] sm:$0xff]  ;;  %v410_v33 = vld [vmem:[#allocation7 + $0xe0] sm:$0xff] }
  0xeb   : > { %1712 = vmatpush1.bf16.msra.mxu1 %v1711_v56  ;;  %v1733_v56 = vpack.c.bf16 %v665_v51, %v663_v50  ;;  %v411_v25 = vld [vmem:[#allocation7 + $0xe8] sm:$0xff]  ;;  %v413_v26 = vld [vmem:[#allocation7 + $0xf8] sm:$0xff]  ;;  %v412_v35 = vld [vmem:[#allocation7 + $0xf0] sm:$0xff] }
  0xec   : > { %1904 = vmatpush1.bf16.msra.mxu0 %v1903_v57  ;;  %1714 = vmatprep.subr.bf16.mxu1 %v1713_v58  ;;  %v662_v57 = vld [vmem:[#allocation8 + $0x280] sm:$0xff]  ;;  %v664_v58 = vld [vmem:[#allocation8 + $0x290] sm:$0xff]  ;;  %v377_v27 = vld [vmem:[%s2735_s10 + $0x8] sm:$0xff]  ;;  %v1937_v34 = vpack.c.bf16 %v413_v26, %v411_v25  ;;  %v1939_v41 = vpack.c.bf16 %v412_v35, %v410_v33 }
  0xed   : > { %1906 = vmatprep.subr.bf16.mxu0 %v1905_v62  ;;  %v667_v62 = vld [vmem:[#allocation8 + $0x2a8] sm:$0xff]  ;;  %v1735_v2 = vpack.c.bf16 %v664_v58, %v662_v57  ;;  %v681_v37 = vld [vmem:[#allocation8 + $0x318] sm:$0xff]  ;;  %v414_v45 = vld [vmem:[#allocation7 + $0x100] sm:$0xff] }
  0xee   : > { %v415_v38 = vld [vmem:[#allocation7 + $0x108] sm:$0xff]  ;;  %v417_v39 = vld [vmem:[#allocation7 + $0x118] sm:$0xff]  ;;  %v416_v47 = vld [vmem:[#allocation7 + $0x110] sm:$0xff] }
  0xef   : > { %1716 = vmatpush1.bf16.msra.mxu1 %v1715_v4  ;;  %v1737_v4 = vpack.c.bf16 %v669_v63, %v667_v62  ;;  %v1941_v46 = vpack.c.bf16 %v417_v39, %v415_v38  ;;  %v685_v49 = vld [vmem:[#allocation8 + $0x338] sm:$0xff]  ;;  %v419_v50 = vld [vmem:[#allocation7 + $0x128] sm:$0xff]  ;;  %v1943_v53 = vpack.c.bf16 %v416_v47, %v414_v45  ;;  %v418_v57 = vld [vmem:[#allocation7 + $0x120] sm:$0xff] }
  0xf0   : > { %1908 = vmatpush1.bf16.msra.mxu0 %v1907_v5  ;;  %1718 = vmatprep.subr.bf16.mxu1 %v1717_v6  ;;  %v666_v5 = vld [vmem:[#allocation8 + $0x2a0] sm:$0xff]  ;;  %v668_v6 = vld [vmem:[#allocation8 + $0x2b0] sm:$0xff]  ;;  %v421_v51 = vld [vmem:[#allocation7 + $0x138] sm:$0xff] }
  0xf1   : > { %1910 = vmatprep.subr.bf16.mxu0 %v1909_v10  ;;  %v671_v10 = vld [vmem:[#allocation8 + $0x2c8] sm:$0xff]  ;;  %v1739_v14 = vpack.c.bf16 %v668_v6, %v666_v5  ;;  %v1945_v58 = vpack.c.bf16 %v421_v51, %v419_v50  ;;  %v420_v59 = vld [vmem:[#allocation7 + $0x130] sm:$0xff]  ;;  %v689_v61 = vld [vmem:[#allocation8 + $0x358] sm:$0xff] }
  0xf2   : > { %903 = vmatmul.mubr.f32.vlgmr.msra.gmra.mrb[0].mxu1 %v574_v16  ;;  %v1931_v16 = vpack.c.bf16 %v404_v9, %v402_v7  ;;  %v423_v62 = vld [vmem:[#allocation7 + $0x148] sm:$0xff]  ;;  %v425_v63 = vld [vmem:[#allocation7 + $0x158] sm:$0xff]  ;;  %v1947_v1 = vpack.c.bf16 %v420_v59, %v418_v57  ;;  %v422_v5 = vld [vmem:[#allocation7 + $0x140] sm:$0xff] }
  0xf3   : > { %1720 = vmatpush1.bf16.msra.mxu1 %v1719_v17  ;;  %1116 = vmatmul.mubr.f32.vlgmr.msra.gmra.mrb[0].mxu0 %v580_v18  ;;  %v1741_v17 = vpack.c.bf16 %v673_v11, %v671_v10  ;;  %v672_v18 = vld [vmem:[#allocation8 + $0x2d0] sm:$0xff]  ;;  %v1949_v6 = vpack.c.bf16 %v425_v63, %v423_v62  ;;  %v693_v9 = vld [vmem:[#allocation8 + $0x378] sm:$0xff]  ;;  %v427_v10 = vld [vmem:[#allocation7 + $0x168] sm:$0xff] }
  0xf4   : > { %1912 = vmatpush1.bf16.msra.mxu0 %v1911_v19  ;;  %1722 = vmatprep.subr.bf16.mxu1 %v1721_v20  ;;  %v406_v19 = vld [vmem:[#allocation7 + $0xc0] sm:$0xff]  ;;  %v408_v20 = vld [vmem:[#allocation7 + $0xd0] sm:$0xff]  ;;  %v1743_v28 = vpack.c.bf16 %v672_v18, %v670_v15  ;;  %v429_v11 = vld [vmem:[#allocation7 + $0x178] sm:$0xff] }
  0xf5   : > { %1914 = vmatprep.subr.bf16.mxu0 %v1913_v24  ;;  %v577_v24 = vld [vmem:[%s2743_s18 + $0x18] sm:$0xff]  ;;  %1186 = vmatprep.mubr.f32.mxu0 %v377_v27  ;;  %v1935_v29 = vpack.c.bf16 %v408_v20, %v406_v19  ;;  %v424_v7 = vld [vmem:[#allocation7 + $0x150] sm:$0xff]  ;;  %v690_v15 = vld [vmem:[#allocation8 + $0x360] sm:$0xff]  ;;  %v1953_v18 = vpack.c.bf16 %v429_v11, %v427_v10 }
  0xf6   : > { %973 = vmatprep.mubr.f32.mxu1 %v577_v24  ;;  %v1951_v13 = vpack.c.bf16 %v424_v7, %v422_v5  ;;  %v428_v19 = vld [vmem:[#allocation7 + $0x170] sm:$0xff]  ;;  %v695_v20 = vld [vmem:[#allocation8 + $0x388] sm:$0xff]  ;;  %v694_v27 = vld [vmem:[#allocation8 + $0x380] sm:$0xff] }
  0xf7   : > { %1724 = vmatpush1.bf16.msra.mxu1 %v1723_v30  ;;  %v1745_v30 = vpack.c.bf16 %v677_v23, %v675_v22  ;;  %v431_v22 = vld [vmem:[#allocation7 + $0x188] sm:$0xff]  ;;  %v433_v23 = vld [vmem:[#allocation7 + $0x198] sm:$0xff]  ;;  %v698_v39 = vld [vmem:[#allocation8 + $0x3a0] sm:$0xff] }
  0xf8   : > { %1916 = vmatpush1.bf16.msra.mxu0 %v1915_v31  ;;  %1726 = vmatprep.subr.bf16.mxu1 %v1725_v32  ;;  %v674_v31 = vld [vmem:[#allocation8 + $0x2e0] sm:$0xff]  ;;  %v676_v32 = vld [vmem:[#allocation8 + $0x2f0] sm:$0xff]  ;;  %v701_v33 = vld [vmem:[#allocation8 + $0x3b8] sm:$0xff] }
  0xf9   : > { %1918 = vmatprep.subr.bf16.mxu0 %v1917_v36  ;;  %v679_v36 = vld [vmem:[#allocation8 + $0x308] sm:$0xff]  ;;  %v1747_v40 = vpack.c.bf16 %v676_v32, %v674_v31  ;;  %v432_v31 = vld [vmem:[#allocation7 + $0x190] sm:$0xff]  ;;  %v437_v35 = vld [vmem:[#allocation7 + $0x1b8] sm:$0xff] }
  0xfa   : > { %v699_v32 = vld [vmem:[#allocation8 + $0x3a8] sm:$0xff]  ;;  %v705_v45 = vld [vmem:[#allocation8 + $0x3d8] sm:$0xff]  ;;  %v702_v51 = vld [vmem:[#allocation8 + $0x3c0] sm:$0xff] }
  0xfb   : > { %1728 = vmatpush1.bf16.msra.mxu1 %v1727_v42  ;;  %v1749_v42 = vpack.c.bf16 %v681_v37, %v679_v36  ;;  %v1769_v38 = vpack.c.bf16 %v701_v33, %v699_v32  ;;  %v441_v47 = vld [vmem:[#allocation7 + $0x1d8] sm:$0xff]  ;;  %v706_v63 = vld [vmem:[#allocation8 + $0x3e0] sm:$0xff]  ;;  %v455_v32 = vld [vmem:[#allocation7 + $0x248] sm:$0xff] }
  0xfc   : > { %1920 = vmatpush1.bf16.msra.mxu0 %v1919_v43  ;;  %1730 = vmatprep.subr.bf16.mxu1 %v1729_v44  ;;  %v678_v43 = vld [vmem:[#allocation8 + $0x300] sm:$0xff]  ;;  %v680_v44 = vld [vmem:[#allocation8 + $0x310] sm:$0xff]  ;;  %v709_v57 = vld [vmem:[#allocation8 + $0x3f8] sm:$0xff] }
  0xfd   : > { %1922 = vmatprep.subr.bf16.mxu0 %v1921_v48  ;;  %v683_v48 = vld [vmem:[#allocation8 + $0x328] sm:$0xff]  ;;  %v1751_v52 = vpack.c.bf16 %v680_v44, %v678_v43  ;;  %v436_v43 = vld [vmem:[#allocation7 + $0x1b0] sm:$0xff]  ;;  %v445_v59 = vld [vmem:[#allocation7 + $0x1f8] sm:$0xff] }
  0xfe   : > { %v703_v44 = vld [vmem:[#allocation8 + $0x3c8] sm:$0xff]  ;;  %v713_v5 = vld [vmem:[#allocation8 + $0x418] sm:$0xff]  ;;  %v710_v11 = vld [vmem:[#allocation8 + $0x400] sm:$0xff] }
  0xff   : > { %1732 = vmatpush1.bf16.msra.mxu1 %v1731_v54  ;;  %v1753_v54 = vpack.c.bf16 %v685_v49, %v683_v48  ;;  %v1773_v50 = vpack.c.bf16 %v705_v45, %v703_v44  ;;  %v449_v7 = vld [vmem:[#allocation7 + $0x218] sm:$0xff]  ;;  %v723_v44 = vld [vmem:[#allocation8 + $0x468] sm:$0xff] }
 0x100   : > { %1924 = vmatpush1.bf16.msra.mxu0 %v1923_v55  ;;  %1734 = vmatprep.subr.bf16.mxu1 %v1733_v56  ;;  %v682_v55 = vld [vmem:[#allocation8 + $0x320] sm:$0xff]  ;;  %v684_v56 = vld [vmem:[#allocation8 + $0x330] sm:$0xff]  ;;  %v457_v33 = vld [vmem:[#allocation7 + $0x258] sm:$0xff] }
 0x101   : > { %1926 = vmatprep.subr.bf16.mxu0 %v1925_v60  ;;  %v687_v60 = vld [vmem:[#allocation8 + $0x348] sm:$0xff]  ;;  %v1755_v0 = vpack.c.bf16 %v684_v56, %v682_v55  ;;  %v440_v55 = vld [vmem:[#allocation7 + $0x1d0] sm:$0xff]  ;;  %v725_v45 = vld [vmem:[#allocation8 + $0x478] sm:$0xff] }
 0x102   : > { %v707_v56 = vld [vmem:[#allocation8 + $0x3e8] sm:$0xff] }
 0x103   : > { %1736 = vmatpush1.bf16.msra.mxu1 %v1735_v2  ;;  %v1757_v2 = vpack.c.bf16 %v689_v61, %v687_v60  ;;  %v1777_v62 = vpack.c.bf16 %v709_v57, %v707_v56  ;;  %v727_v56 = vld [vmem:[#allocation8 + $0x488] sm:$0xff]  ;;  %v729_v57 = vld [vmem:[#allocation8 + $0x498] sm:$0xff] }
 0x104   : > { %1928 = vmatpush1.bf16.msra.mxu0 %v1927_v3  ;;  %1738 = vmatprep.subr.bf16.mxu1 %v1737_v4  ;;  %v686_v3 = vld [vmem:[#allocation8 + $0x340] sm:$0xff]  ;;  %v688_v4 = vld [vmem:[#allocation8 + $0x350] sm:$0xff] }
 0x105   : > { %1930 = vmatprep.subr.bf16.mxu0 %v1929_v8  ;;  %v691_v8 = vld [vmem:[#allocation8 + $0x368] sm:$0xff]  ;;  %v1759_v12 = vpack.c.bf16 %v688_v4, %v686_v3  ;;  %v444_v3 = vld [vmem:[#allocation7 + $0x1f0] sm:$0xff] }
 0x106   : > { %v711_v4 = vld [vmem:[#allocation8 + $0x408] sm:$0xff] }
 0x107   : > { %1740 = vmatpush1.bf16.msra.mxu1 %v1739_v14  ;;  %v1761_v14 = vpack.c.bf16 %v693_v9, %v691_v8  ;;  %v1781_v10 = vpack.c.bf16 %v713_v5, %v711_v4  ;;  %v731_v4 = vld [vmem:[#allocation8 + $0x4a8] sm:$0xff]  ;;  %v733_v5 = vld [vmem:[#allocation8 + $0x4b8] sm:$0xff] }
 0x108   : > { %1932 = vmatpush1.bf16.msra.mxu0 %v1931_v16  ;;  %1742 = vmatprep.subr.bf16.mxu1 %v1741_v17  ;;  %v692_v16 = vld [vmem:[#allocation8 + $0x370] sm:$0xff]  ;;  %v426_v17 = vld [vmem:[#allocation7 + $0x160] sm:$0xff] }
 0x109   : > { %1934 = vmatprep.subr.bf16.mxu0 %v1933_v21  ;;  %v697_v21 = vld [vmem:[#allocation8 + $0x398] sm:$0xff]  ;;  %v1763_v24 = vpack.c.bf16 %v692_v16, %v690_v15  ;;  %v1955_v25 = vpack.c.bf16 %v428_v19, %v426_v17  ;;  %v448_v15 = vld [vmem:[#allocation7 + $0x210] sm:$0xff]  ;;  %v715_v16 = vld [vmem:[#allocation8 + $0x428] sm:$0xff] }
 0x10a   : > { %v1765_v26 = vpack.c.bf16 %v697_v21, %v695_v20  ;;  %v717_v17 = vld [vmem:[#allocation8 + $0x438] sm:$0xff]  ;;  %v576_v20 = vld [vmem:[%s2743_s18 + $0x10] sm:$0xff] }
 0x10b   : > { %1744 = vmatpush1.bf16.msra.mxu1 %v1743_v28  ;;  %v696_v28 = vld [vmem:[#allocation8 + $0x390] sm:$0xff]  ;;  %v453_v19 = vld [vmem:[#allocation7 + $0x238] sm:$0xff] }
 0x10c   : > { %1936 = vmatpush1.bf16.msra.mxu0 %v1935_v29  ;;  %1746 = vmatprep.subr.bf16.mxu1 %v1745_v30  ;;  %v430_v29 = vld [vmem:[#allocation7 + $0x180] sm:$0xff]  ;;  %v1957_v30 = vpack.c.bf16 %v433_v23, %v431_v22  ;;  %v1767_v36 = vpack.c.bf16 %v696_v28, %v694_v27 }
 0x10d   : > { %1938 = vmatprep.subr.bf16.mxu0 %v1937_v34  ;;  %v435_v34 = vld [vmem:[#allocation7 + $0x1a8] sm:$0xff]  ;;  %v1959_v37 = vpack.c.bf16 %v432_v31, %v430_v29  ;;  %v376_v22 = vld [vmem:[%s2735_s10] sm:$0xff]  ;;  %v721_v31 = vld [vmem:[#allocation8 + $0x458] sm:$0xff] }
 0x10e   : > { %v450_v27 = vld [vmem:[#allocation7 + $0x220] sm:$0xff]  ;;  %v452_v29 = vld [vmem:[#allocation7 + $0x230] sm:$0xff] }
 0x10f   : > { %1748 = vmatpush1.bf16.msra.mxu1 %v1747_v40  ;;  %v700_v40 = vld [vmem:[#allocation8 + $0x3b0] sm:$0xff] }
 0x110   : > { %1940 = vmatpush1.bf16.msra.mxu0 %v1939_v41  ;;  %1750 = vmatprep.subr.bf16.mxu1 %v1749_v42  ;;  %v434_v41 = vld [vmem:[#allocation7 + $0x1a0] sm:$0xff]  ;;  %v1961_v42 = vpack.c.bf16 %v437_v35, %v435_v34  ;;  %v1771_v48 = vpack.c.bf16 %v700_v40, %v698_v39  ;;  %v579_v34 = vld [vmem:[%s2743_s18 + $0x28] sm:$0xff]  ;;  %v720_v40 = vld [vmem:[#allocation8 + $0x450] sm:$0xff] }
 0x111   : > { %1942 = vmatprep.subr.bf16.mxu0 %v1941_v46  ;;  %v439_v46 = vld [vmem:[#allocation7 + $0x1c8] sm:$0xff]  ;;  %v1963_v49 = vpack.c.bf16 %v436_v43, %v434_v41  ;;  %v718_v39 = vld [vmem:[#allocation8 + $0x440] sm:$0xff]  ;;  %v456_v43 = vld [vmem:[#allocation7 + $0x250] sm:$0xff] }
 0x112   : > { %v454_v41 = vld [vmem:[#allocation7 + $0x240] sm:$0xff] }
 0x113   : > { %1752 = vmatpush1.bf16.msra.mxu1 %v1751_v52  ;;  %v704_v52 = vld [vmem:[#allocation8 + $0x3d0] sm:$0xff] }
 0x114   : > { %1944 = vmatpush1.bf16.msra.mxu0 %v1943_v53  ;;  %1754 = vmatprep.subr.bf16.mxu1 %v1753_v54  ;;  %v438_v53 = vld [vmem:[#allocation7 + $0x1c0] sm:$0xff]  ;;  %v1965_v54 = vpack.c.bf16 %v441_v47, %v439_v46  ;;  %v1775_v60 = vpack.c.bf16 %v704_v52, %v702_v51  ;;  %v459_v46 = vld [vmem:[#allocation7 + $0x268] sm:$0xff]  ;;  %v461_v47 = vld [vmem:[#allocation7 + $0x278] sm:$0xff] }
 0x115   : > { %1946 = vmatprep.subr.bf16.mxu0 %v1945_v58  ;;  %v443_v58 = vld [vmem:[#allocation7 + $0x1e8] sm:$0xff]  ;;  %v1967_v61 = vpack.c.bf16 %v440_v55, %v438_v53  ;;  %v722_v51 = vld [vmem:[#allocation8 + $0x460] sm:$0xff]  ;;  %v724_v52 = vld [vmem:[#allocation8 + $0x470] sm:$0xff] }
 0x116   : > { %v458_v53 = vld [vmem:[#allocation7 + $0x260] sm:$0xff]  ;;  %v460_v55 = vld [vmem:[#allocation7 + $0x270] sm:$0xff] }
 0x117   : > { %1756 = vmatpush1.bf16.msra.mxu1 %v1755_v0  ;;  %v708_v0 = vld [vmem:[#allocation8 + $0x3f0] sm:$0xff] }
 0x118   : > { %1948 = vmatpush1.bf16.msra.mxu0 %v1947_v1  ;;  %1758 = vmatprep.subr.bf16.mxu1 %v1757_v2  ;;  %v442_v1 = vld [vmem:[#allocation7 + $0x1e0] sm:$0xff]  ;;  %v1969_v2 = vpack.c.bf16 %v445_v59, %v443_v58  ;;  %v1779_v8 = vpack.c.bf16 %v708_v0, %v706_v63  ;;  %v463_v58 = vld [vmem:[#allocation7 + $0x288] sm:$0xff]  ;;  %v465_v59 = vld [vmem:[#allocation7 + $0x298] sm:$0xff] }
 0x119   : > { %1950 = vmatprep.subr.bf16.mxu0 %v1949_v6  ;;  %v447_v6 = vld [vmem:[#allocation7 + $0x208] sm:$0xff]  ;;  %v1971_v9 = vpack.c.bf16 %v444_v3, %v442_v1  ;;  %v726_v63 = vld [vmem:[#allocation8 + $0x480] sm:$0xff]  ;;  %v728_v0 = vld [vmem:[#allocation8 + $0x490] sm:$0xff] }
 0x11a   : > { %v462_v1 = vld [vmem:[#allocation7 + $0x280] sm:$0xff]  ;;  %v464_v3 = vld [vmem:[#allocation7 + $0x290] sm:$0xff] }
 0x11b   : > { %1760 = vmatpush1.bf16.msra.mxu1 %v1759_v12  ;;  %v712_v12 = vld [vmem:[#allocation8 + $0x410] sm:$0xff] }
 0x11c   : > { %1952 = vmatpush1.bf16.msra.mxu0 %v1951_v13  ;;  %1762 = vmatprep.subr.bf16.mxu1 %v1761_v14  ;;  %v446_v13 = vld [vmem:[#allocation7 + $0x200] sm:$0xff]  ;;  %v1973_v14 = vpack.c.bf16 %v449_v7, %v447_v6  ;;  %v1783_v21 = vpack.c.bf16 %v712_v12, %v710_v11  ;;  %v467_v6 = vld [vmem:[#allocation7 + $0x2a8] sm:$0xff]  ;;  %v469_v7 = vld [vmem:[#allocation7 + $0x2b8] sm:$0xff] }
 0x11d   : > { %1954 = vmatprep.subr.bf16.mxu0 %v1953_v18  ;;  %v451_v18 = vld [vmem:[#allocation7 + $0x228] sm:$0xff]  ;;  %v1975_v23 = vpack.c.bf16 %v448_v15, %v446_v13  ;;  %v730_v11 = vld [vmem:[#allocation8 + $0x4a0] sm:$0xff]  ;;  %v732_v12 = vld [vmem:[#allocation8 + $0x4b0] sm:$0xff] }
 0x11e   : > { %v1977_v28 = vpack.c.bf16 %v453_v19, %v451_v18  ;;  %v466_v13 = vld [vmem:[#allocation7 + $0x2a0] sm:$0xff]  ;;  %v468_v15 = vld [vmem:[#allocation7 + $0x2b0] sm:$0xff]  ;;  %v471_v18 = vld [vmem:[#allocation7 + $0x2c8] sm:$0xff] }
 0x11f   : > { %1764 = vmatpush1.bf16.msra.mxu1 %v1763_v24  ;;  %v1785_v24 = vpack.c.bf16 %v717_v17, %v715_v16  ;;  %v735_v16 = vld [vmem:[#allocation8 + $0x4c8] sm:$0xff]  ;;  %v737_v17 = vld [vmem:[#allocation8 + $0x4d8] sm:$0xff] }
 0x120   : > { %1956 = vmatpush1.bf16.msra.mxu0 %v1955_v25  ;;  %1766 = vmatprep.subr.bf16.mxu1 %v1765_v26  ;;  %v714_v25 = vld [vmem:[#allocation8 + $0x420] sm:$0xff]  ;;  %v716_v26 = vld [vmem:[#allocation8 + $0x430] sm:$0xff]  ;;  %v473_v19 = vld [vmem:[#allocation7 + $0x2d8] sm:$0xff] }
 0x121   : > { %1958 = vmatprep.subr.bf16.mxu0 %v1957_v30  ;;  %v719_v30 = vld [vmem:[#allocation8 + $0x448] sm:$0xff]  ;;  %v1787_v35 = vpack.c.bf16 %v716_v26, %v714_v25  ;;  %v470_v25 = vld [vmem:[#allocation7 + $0x2c0] sm:$0xff]  ;;  %v1997_v26 = vpack.c.bf16 %v473_v19, %v471_v18 }
 0x122   : > { %v754_v19 = vld [vmem:[#allocation8 + $0x560] sm:$0xff] }
 0x123   : > { %1768 = vmatpush1.bf16.msra.mxu1 %v1767_v36  ;;  %v379_v36 = vld [vmem:[%s2735_s10 + $0x18] sm:$0xff] }
 0x124   : > { %1960 = vmatpush1.bf16.msra.mxu0 %v1959_v37  ;;  %1770 = vmatprep.subr.bf16.mxu1 %v1769_v38  ;;  %v1979_v37 = vpack.c.bf16 %v452_v29, %v450_v27  ;;  %v1789_v38 = vpack.c.bf16 %v721_v31, %v719_v30  ;;  %v472_v27 = vld [vmem:[#allocation7 + $0x2d0] sm:$0xff]  ;;  %v741_v29 = vld [vmem:[#allocation8 + $0x4f8] sm:$0xff]  ;;  %v475_v30 = vld [vmem:[#allocation7 + $0x2e8] sm:$0xff] }
 0x125   : > { %1962 = vmatprep.subr.bf16.mxu0 %v1961_v42  ;;  %v1981_v42 = vpack.c.bf16 %v457_v33, %v455_v32  ;;  %v477_v31 = vld [vmem:[#allocation7 + $0x2f8] sm:$0xff]  ;;  %v1999_v33 = vpack.c.bf16 %v472_v27, %v470_v25 }
 0x126   : > { %v761_v25 = vld [vmem:[#allocation8 + $0x598] sm:$0xff] }
 0x127   : > { %1772 = vmatpush1.bf16.msra.mxu1 %v1771_v48  ;;  %v1791_v48 = vpack.c.bf16 %v720_v40, %v718_v39  ;;  %v476_v39 = vld [vmem:[#allocation7 + $0x2f0] sm:$0xff]  ;;  %v743_v40 = vld [vmem:[#allocation8 + $0x508] sm:$0xff]  ;;  %v497_v27 = vld [vmem:[#allocation7 + $0x398] sm:$0xff] }
 0x128   : > { %1964 = vmatpush1.bf16.msra.mxu0 %v1963_v49  ;;  %1774 = vmatprep.subr.bf16.mxu1 %v1773_v50  ;;  %v1983_v49 = vpack.c.bf16 %v456_v43, %v454_v41  ;;  %v1793_v50 = vpack.c.bf16 %v725_v45, %v723_v44  ;;  %v745_v41 = vld [vmem:[#allocation8 + $0x518] sm:$0xff] }
 0x129   : > { %1966 = vmatprep.subr.bf16.mxu0 %v1965_v54  ;;  %v1985_v54 = vpack.c.bf16 %v461_v47, %v459_v46  ;;  %v481_v43 = vld [vmem:[#allocation7 + $0x318] sm:$0xff]  ;;  %v1813_v46 = vpack.c.bf16 %v745_v41, %v743_v40  ;;  %v742_v47 = vld [vmem:[#allocation8 + $0x500] sm:$0xff] }
 0x12b   : > { %1776 = vmatpush1.bf16.msra.mxu1 %v1775_v60  ;;  %v1795_v60 = vpack.c.bf16 %v724_v52, %v722_v51  ;;  %v480_v51 = vld [vmem:[#allocation7 + $0x310] sm:$0xff]  ;;  %v747_v52 = vld [vmem:[#allocation8 + $0x528] sm:$0xff] }
 0x12c   : > { %1968 = vmatpush1.bf16.msra.mxu0 %v1967_v61  ;;  %1778 = vmatprep.subr.bf16.mxu1 %v1777_v62  ;;  %v1987_v61 = vpack.c.bf16 %v460_v55, %v458_v53  ;;  %v1797_v62 = vpack.c.bf16 %v729_v57, %v727_v56  ;;  %v749_v53 = vld [vmem:[#allocation8 + $0x538] sm:$0xff] }
 0x12d   : > { %1970 = vmatprep.subr.bf16.mxu0 %v1969_v2  ;;  %v1989_v2 = vpack.c.bf16 %v465_v59, %v463_v58  ;;  %v485_v55 = vld [vmem:[#allocation7 + $0x338] sm:$0xff]  ;;  %v1817_v58 = vpack.c.bf16 %v749_v53, %v747_v52  ;;  %v746_v59 = vld [vmem:[#allocation8 + $0x520] sm:$0xff] }
 0x12f   : > { %1780 = vmatpush1.bf16.msra.mxu1 %v1779_v8  ;;  %v1799_v8 = vpack.c.bf16 %v728_v0, %v726_v63  ;;  %v484_v63 = vld [vmem:[#allocation7 + $0x330] sm:$0xff]  ;;  %v751_v0 = vld [vmem:[#allocation8 + $0x548] sm:$0xff] }
 0x130   : > { %1972 = vmatpush1.bf16.msra.mxu0 %v1971_v9  ;;  %1782 = vmatprep.subr.bf16.mxu1 %v1781_v10  ;;  %v1991_v9 = vpack.c.bf16 %v464_v3, %v462_v1  ;;  %v1801_v10 = vpack.c.bf16 %v733_v5, %v731_v4  ;;  %v753_v1 = vld [vmem:[#allocation8 + $0x558] sm:$0xff] }
 0x131   : > { %1974 = vmatprep.subr.bf16.mxu0 %v1973_v14  ;;  %v1993_v14 = vpack.c.bf16 %v469_v7, %v467_v6  ;;  %v489_v3 = vld [vmem:[#allocation7 + $0x358] sm:$0xff]  ;;  %v1821_v6 = vpack.c.bf16 %v753_v1, %v751_v0  ;;  %v750_v7 = vld [vmem:[#allocation8 + $0x540] sm:$0xff] }
 0x132   : > { %974 = vmatmul.mubr.f32.vlgmr.msra.gmra.mrb[0].mxu1 %v576_v20  ;;  %v1803_v20 = vpack.c.bf16 %v732_v12, %v730_v11  ;;  %v488_v11 = vld [vmem:[#allocation7 + $0x350] sm:$0xff]  ;;  %v755_v12 = vld [vmem:[#allocation8 + $0x568] sm:$0xff] }
 0x133   : > { %1784 = vmatpush1.bf16.msra.mxu1 %v1783_v21  ;;  %1187 = vmatmul.mubr.f32.vlgmr.msra.gmra.mrb[0].mxu0 %v376_v22  ;;  %v1995_v21 = vpack.c.bf16 %v468_v15, %v466_v13  ;;  %v1805_v22 = vpack.c.bf16 %v737_v17, %v735_v16  ;;  %v757_v13 = vld [vmem:[#allocation8 + $0x578] sm:$0xff] }
 0x134   : > { %1976 = vmatpush1.bf16.msra.mxu0 %v1975_v23  ;;  %1786 = vmatprep.subr.bf16.mxu1 %v1785_v24  ;;  %v734_v23 = vld [vmem:[#allocation8 + $0x4c0] sm:$0xff]  ;;  %v736_v24 = vld [vmem:[#allocation8 + $0x4d0] sm:$0xff]  ;;  %v493_v15 = vld [vmem:[#allocation7 + $0x378] sm:$0xff]  ;;  %v1825_v18 = vpack.c.bf16 %v757_v13, %v755_v12 }
 0x135   : > { %1978 = vmatprep.subr.bf16.mxu0 %v1977_v28  ;;  %1044 = vmatprep.mubr.f32.mxu1 %v579_v34  ;;  %v739_v28 = vld [vmem:[#allocation8 + $0x4e8] sm:$0xff]  ;;  %v1807_v32 = vpack.c.bf16 %v736_v24, %v734_v23  ;;  %v492_v23 = vld [vmem:[#allocation7 + $0x370] sm:$0xff]  ;;  %v510_v13 = vld [vmem:[#allocation7 + $0x400] sm:$0xff] }
 0x136   : > { %1257 = vmatprep.mubr.f32.mxu0 %v379_v36  ;;  %v1809_v34 = vpack.c.bf16 %v741_v29, %v739_v28  ;;  %v740_v36 = vld [vmem:[#allocation8 + $0x4f0] sm:$0xff]  ;;  %v759_v24 = vld [vmem:[#allocation8 + $0x588] sm:$0xff] }
 0x137   : > { %1788 = vmatpush1.bf16.msra.mxu1 %v1787_v35  ;;  %v738_v35 = vld [vmem:[#allocation8 + $0x4e0] sm:$0xff] }
 0x138   : > { %1980 = vmatpush1.bf16.msra.mxu0 %v1979_v37  ;;  %1790 = vmatprep.subr.bf16.mxu1 %v1789_v38  ;;  %v474_v37 = vld [vmem:[#allocation7 + $0x2e0] sm:$0xff]  ;;  %v2001_v38 = vpack.c.bf16 %v477_v31, %v475_v30  ;;  %v1811_v44 = vpack.c.bf16 %v740_v36, %v738_v35  ;;  %v1829_v30 = vpack.c.bf16 %v761_v25, %v759_v24  ;;  %v496_v35 = vld [vmem:[#allocation7 + $0x390] sm:$0xff]  ;;  %v763_v36 = vld [vmem:[#allocation8 + $0x5a8] sm:$0xff] }
 0x139   : > { %1982 = vmatprep.subr.bf16.mxu0 %v1981_v42  ;;  %v479_v42 = vld [vmem:[#allocation7 + $0x308] sm:$0xff]  ;;  %v2003_v45 = vpack.c.bf16 %v476_v39, %v474_v37  ;;  %v758_v31 = vld [vmem:[#allocation8 + $0x580] sm:$0xff]  ;;  %v765_v37 = vld [vmem:[#allocation8 + $0x5b8] sm:$0xff] }
 0x13a   : > { %v501_v39 = vld [vmem:[#allocation7 + $0x3b8] sm:$0xff]  ;;  %v519_v24 = vld [vmem:[#allocation7 + $0x448] sm:$0xff] }
 0x13b   : > { %1792 = vmatpush1.bf16.msra.mxu1 %v1791_v48  ;;  %v744_v48 = vld [vmem:[#allocation8 + $0x510] sm:$0xff]  ;;  %v521_v25 = vld [vmem:[#allocation7 + $0x458] sm:$0xff] }
 0x13c   : > { %1984 = vmatpush1.bf16.msra.mxu0 %v1983_v49  ;;  %1794 = vmatprep.subr.bf16.mxu1 %v1793_v50  ;;  %v478_v49 = vld [vmem:[#allocation7 + $0x300] sm:$0xff]  ;;  %v2005_v50 = vpack.c.bf16 %v481_v43, %v479_v42  ;;  %v1815_v56 = vpack.c.bf16 %v744_v48, %v742_v47  ;;  %v1833_v42 = vpack.c.bf16 %v765_v37, %v763_v36  ;;  %v500_v47 = vld [vmem:[#allocation7 + $0x3b0] sm:$0xff]  ;;  %v767_v48 = vld [vmem:[#allocation8 + $0x5c8] sm:$0xff] }
 0x13d   : > { %1986 = vmatprep.subr.bf16.mxu0 %v1985_v54  ;;  %v483_v54 = vld [vmem:[#allocation7 + $0x328] sm:$0xff]  ;;  %v2007_v57 = vpack.c.bf16 %v480_v51, %v478_v49  ;;  %v762_v43 = vld [vmem:[#allocation8 + $0x5a0] sm:$0xff]  ;;  %v769_v49 = vld [vmem:[#allocation8 + $0x5d8] sm:$0xff] }
 0x13e   : > { %v505_v51 = vld [vmem:[#allocation7 + $0x3d8] sm:$0xff]  ;;  %v527_v36 = vld [vmem:[#allocation7 + $0x488] sm:$0xff] }
 0x13f   : > { %1796 = vmatpush1.bf16.msra.mxu1 %v1795_v60  ;;  %v748_v60 = vld [vmem:[#allocation8 + $0x530] sm:$0xff]  ;;  %v529_v37 = vld [vmem:[#allocation7 + $0x498] sm:$0xff] }
 0x140   : > { %1988 = vmatpush1.bf16.msra.mxu0 %v1987_v61  ;;  %1798 = vmatprep.subr.bf16.mxu1 %v1797_v62  ;;  %v482_v61 = vld [vmem:[#allocation7 + $0x320] sm:$0xff]  ;;  %v2009_v62 = vpack.c.bf16 %v485_v55, %v483_v54  ;;  %v1819_v4 = vpack.c.bf16 %v748_v60, %v746_v59  ;;  %v1837_v54 = vpack.c.bf16 %v769_v49, %v767_v48  ;;  %v504_v59 = vld [vmem:[#allocation7 + $0x3d0] sm:$0xff]  ;;  %v771_v60 = vld [vmem:[#allocation8 + $0x5e8] sm:$0xff] }
 0x141   : > { %1990 = vmatprep.subr.bf16.mxu0 %v1989_v2  ;;  %v487_v2 = vld [vmem:[#allocation7 + $0x348] sm:$0xff]  ;;  %v2011_v5 = vpack.c.bf16 %v484_v63, %v482_v61  ;;  %v766_v55 = vld [vmem:[#allocation8 + $0x5c0] sm:$0xff]  ;;  %v773_v61 = vld [vmem:[#allocation8 + $0x5f8] sm:$0xff] }
 0x142   : > { %v509_v63 = vld [vmem:[#allocation7 + $0x3f8] sm:$0xff]  ;;  %v535_v48 = vld [vmem:[#allocation7 + $0x4c8] sm:$0xff] }
 0x143   : > { %1800 = vmatpush1.bf16.msra.mxu1 %v1799_v8  ;;  %v752_v8 = vld [vmem:[#allocation8 + $0x550] sm:$0xff]  ;;  %v537_v49 = vld [vmem:[#allocation7 + $0x4d8] sm:$0xff] }
 0x144   : > { %1992 = vmatpush1.bf16.msra.mxu0 %v1991_v9  ;;  %1802 = vmatprep.subr.bf16.mxu1 %v1801_v10  ;;  %v486_v9 = vld [vmem:[#allocation7 + $0x340] sm:$0xff]  ;;  %v2013_v10 = vpack.c.bf16 %v489_v3, %v487_v2  ;;  %v1823_v16 = vpack.c.bf16 %v752_v8, %v750_v7  ;;  %v1841_v2 = vpack.c.bf16 %v773_v61, %v771_v60  ;;  %v508_v7 = vld [vmem:[#allocation7 + $0x3f0] sm:$0xff]  ;;  %v511_v8 = vld [vmem:[#allocation7 + $0x408] sm:$0xff] }
 0x145   : > { %1994 = vmatprep.subr.bf16.mxu0 %v1993_v14  ;;  %v491_v14 = vld [vmem:[#allocation7 + $0x368] sm:$0xff]  ;;  %v2015_v17 = vpack.c.bf16 %v488_v11, %v486_v9  ;;  %v770_v3 = vld [vmem:[#allocation8 + $0x5e0] sm:$0xff]  ;;  %v513_v9 = vld [vmem:[#allocation7 + $0x418] sm:$0xff] }
 0x146   : > { %v2037_v12 = vpack.c.bf16 %v513_v9, %v511_v8  ;;  %v543_v60 = vld [vmem:[#allocation7 + $0x508] sm:$0xff]  ;;  %v545_v61 = vld [vmem:[#allocation7 + $0x518] sm:$0xff] }
 0x147   : > { %1804 = vmatpush1.bf16.msra.mxu1 %v1803_v20  ;;  %v756_v20 = vld [vmem:[#allocation8 + $0x570] sm:$0xff]  ;;  %v551_v8 = vld [vmem:[#allocation7 + $0x548] sm:$0xff]  ;;  %v553_v9 = vld [vmem:[#allocation7 + $0x558] sm:$0xff] }
 0x148   : > { %1996 = vmatpush1.bf16.msra.mxu0 %v1995_v21  ;;  %1806 = vmatprep.subr.bf16.mxu1 %v1805_v22  ;;  %v490_v21 = vld [vmem:[#allocation7 + $0x360] sm:$0xff]  ;;  %v2017_v22 = vpack.c.bf16 %v493_v15, %v491_v14  ;;  %v1827_v28 = vpack.c.bf16 %v756_v20, %v754_v19  ;;  %v512_v14 = vld [vmem:[#allocation7 + $0x410] sm:$0xff]  ;;  %v515_v15 = vld [vmem:[#allocation7 + $0x428] sm:$0xff] }
 0x149   : > { %1998 = vmatprep.subr.bf16.mxu0 %v1997_v26  ;;  %v495_v26 = vld [vmem:[#allocation7 + $0x388] sm:$0xff]  ;;  %v2019_v29 = vpack.c.bf16 %v492_v23, %v490_v21  ;;  %v2039_v19 = vpack.c.bf16 %v512_v14, %v510_v13  ;;  %v514_v21 = vld [vmem:[#allocation7 + $0x420] sm:$0xff]  ;;  %v552_v13 = vld [vmem:[#allocation7 + $0x550] sm:$0xff] }
 0x14a   : > { %v381_v23 = vld [vmem:[%s2735_s10 + $0x28] sm:$0xff] }
 0x14b   : > { %1808 = vmatpush1.bf16.msra.mxu1 %v1807_v32  ;;  %v760_v32 = vld [vmem:[#allocation8 + $0x590] sm:$0xff]  ;;  %v555_v14 = vld [vmem:[#allocation7 + $0x568] sm:$0xff] }
 0x14c   : > { %2000 = vmatpush1.bf16.msra.mxu0 %v1999_v33  ;;  %1810 = vmatprep.subr.bf16.mxu1 %v1809_v34  ;;  %v494_v33 = vld [vmem:[#allocation7 + $0x380] sm:$0xff]  ;;  %v2021_v34 = vpack.c.bf16 %v497_v27, %v495_v26  ;;  %v1831_v40 = vpack.c.bf16 %v760_v32, %v758_v31  ;;  %v2045_v27 = vpack.c.bf16 %v521_v25, %v519_v24  ;;  %v525_v31 = vld [vmem:[#allocation7 + $0x478] sm:$0xff]  ;;  %v560_v25 = vld [vmem:[#allocation7 + $0x590] sm:$0xff] }
 0x14d   : > { %2002 = vmatprep.subr.bf16.mxu0 %v2001_v38  ;;  %v499_v38 = vld [vmem:[#allocation7 + $0x3a8] sm:$0xff]  ;;  %v2023_v41 = vpack.c.bf16 %v496_v35, %v494_v33  ;;  %v524_v35 = vld [vmem:[#allocation7 + $0x470] sm:$0xff]  ;;  %v558_v24 = vld [vmem:[#allocation7 + $0x580] sm:$0xff] }
 0x14f   : > { %1812 = vmatpush1.bf16.msra.mxu1 %v1811_v44  ;;  %v764_v44 = vld [vmem:[#allocation8 + $0x5b0] sm:$0xff] }
 0x150   : > { %2004 = vmatpush1.bf16.msra.mxu0 %v2003_v45  ;;  %1814 = vmatprep.subr.bf16.mxu1 %v1813_v46  ;;  %v498_v45 = vld [vmem:[#allocation7 + $0x3a0] sm:$0xff]  ;;  %v2025_v46 = vpack.c.bf16 %v501_v39, %v499_v38  ;;  %v1835_v52 = vpack.c.bf16 %v764_v44, %v762_v43  ;;  %v2053_v39 = vpack.c.bf16 %v529_v37, %v527_v36  ;;  %v533_v43 = vld [vmem:[#allocation7 + $0x4b8] sm:$0xff]  ;;  %v568_v37 = vld [vmem:[#allocation7 + $0x5d0] sm:$0xff] }
 0x151   : > { %2006 = vmatprep.subr.bf16.mxu0 %v2005_v50  ;;  %v503_v50 = vld [vmem:[#allocation7 + $0x3c8] sm:$0xff]  ;;  %v2027_v53 = vpack.c.bf16 %v500_v47, %v498_v45  ;;  %v532_v47 = vld [vmem:[#allocation7 + $0x4b0] sm:$0xff]  ;;  %v566_v36 = vld [vmem:[#allocation7 + $0x5c0] sm:$0xff] }
 0x153   : > { %1816 = vmatpush1.bf16.msra.mxu1 %v1815_v56  ;;  %v768_v56 = vld [vmem:[#allocation8 + $0x5d0] sm:$0xff] }
 0x154   : > { %2008 = vmatpush1.bf16.msra.mxu0 %v2007_v57  ;;  %1818 = vmatprep.subr.bf16.mxu1 %v1817_v58  ;;  %v502_v57 = vld [vmem:[#allocation7 + $0x3c0] sm:$0xff]  ;;  %v2029_v58 = vpack.c.bf16 %v505_v51, %v503_v50  ;;  %v1839_v0 = vpack.c.bf16 %v768_v56, %v766_v55  ;;  %v2061_v51 = vpack.c.bf16 %v537_v49, %v535_v48  ;;  %v541_v55 = vld [vmem:[#allocation7 + $0x4f8] sm:$0xff] }
 0x155   : > { %2010 = vmatprep.subr.bf16.mxu0 %v2009_v62  ;;  %v507_v62 = vld [vmem:[#allocation7 + $0x3e8] sm:$0xff]  ;;  %v2031_v1 = vpack.c.bf16 %v504_v59, %v502_v57  ;;  %v540_v59 = vld [vmem:[#allocation7 + $0x4f0] sm:$0xff]  ;;  %v1351_v48 = vld [vmem:[#allocation10] sm:$0xff] }
 0x157   : > { %1820 = vmatpush1.bf16.msra.mxu1 %v1819_v4  ;;  %v772_v4 = vld [vmem:[#allocation8 + $0x5f0] sm:$0xff] }
 0x158   : > { %2012 = vmatpush1.bf16.msra.mxu0 %v2011_v5  ;;  %1822 = vmatprep.subr.bf16.mxu1 %v1821_v6  ;;  %v2033_v5 = vpack.c.bf16 %v509_v63, %v507_v62  ;;  %v506_v6 = vld [vmem:[#allocation7 + $0x3e0] sm:$0xff]  ;;  %v2069_v63 = vpack.c.bf16 %v545_v61, %v543_v60 }
 0x159   : > { %2014 = vmatprep.subr.bf16.mxu0 %v2013_v10  ;;  %v1843_v10 = vpack.c.bf16 %v772_v4, %v770_v3  ;;  %v2035_v11 = vpack.c.bf16 %v508_v7, %v506_v6  ;;  %v549_v3 = vld [vmem:[#allocation7 + $0x538] sm:$0xff]  ;;  %v546_v6 = vld [vmem:[#allocation7 + $0x520] sm:$0xff]  ;;  %v548_v7 = vld [vmem:[#allocation7 + $0x530] sm:$0xff] }
 0x15a   : > { %v1355_v61 = vld [vmem:[#allocation10 + $0x20] sm:$0xff] }
 0x15b   : > { %1824 = vmatpush1.bf16.msra.mxu1 %v1823_v16  ;;  %v517_v16 = vld [vmem:[#allocation7 + $0x438] sm:$0xff] }
 0x15c   : > { %2016 = vmatpush1.bf16.msra.mxu0 %v2015_v17  ;;  %1826 = vmatprep.subr.bf16.mxu1 %v1825_v18  ;;  %v578_v17 = vld [vmem:[%s2743_s18 + $0x20] sm:$0xff]  ;;  %v2041_v20 = vpack.c.bf16 %v517_v16, %v515_v15  ;;  %v557_v15 = vld [vmem:[#allocation7 + $0x578] sm:$0xff] }
 0x15d   : > { %2018 = vmatprep.subr.bf16.mxu0 %v2017_v22  ;;  %v378_v18 = vld [vmem:[%s2735_s10 + $0x10] sm:$0xff] }
 0x15e   : > { %v516_v22 = vld [vmem:[#allocation7 + $0x430] sm:$0xff] }
 0x15f   : > { %1828 = vmatpush1.bf16.msra.mxu1 %v1827_v28  ;;  %v2043_v26 = vpack.c.bf16 %v516_v22, %v514_v21  ;;  %v518_v28 = vld [vmem:[#allocation7 + $0x440] sm:$0xff]  ;;  %v561_v21 = vld [vmem:[#allocation7 + $0x598] sm:$0xff] }
 0x160   : > { %2020 = vmatpush1.bf16.msra.mxu0 %v2019_v29  ;;  %1830 = vmatprep.subr.bf16.mxu1 %v1829_v30  ;;  %v520_v29 = vld [vmem:[#allocation7 + $0x450] sm:$0xff]  ;;  %v523_v30 = vld [vmem:[#allocation7 + $0x468] sm:$0xff] }
 0x161   : > { %2022 = vmatprep.subr.bf16.mxu0 %v2021_v34  ;;  %v2047_v32 = vpack.c.bf16 %v520_v29, %v518_v28  ;;  %v2049_v33 = vpack.c.bf16 %v525_v31, %v523_v30  ;;  %v522_v34 = vld [vmem:[#allocation7 + $0x460] sm:$0xff]  ;;  %v2087_v28 = vpack.c.bf16 %v560_v25, %v558_v24  ;;  %v564_v31 = vld [vmem:[#allocation7 + $0x5b0] sm:$0xff]  ;;  %v1382_v25 = vld [vmem:[#allocation10 + $0xf8] sm:$0xff] }
 0x162   : > { %v2051_v38 = vpack.c.bf16 %v524_v35, %v522_v34  ;;  %v562_v30 = vld [vmem:[#allocation7 + $0x5a0] sm:$0xff]  ;;  %v1381_v24 = vld [vmem:[#allocation10 + $0xf0] sm:$0xff] }
 0x163   : > { %1832 = vmatpush1.bf16.msra.mxu1 %v1831_v40  ;;  %v526_v40 = vld [vmem:[#allocation7 + $0x480] sm:$0xff]  ;;  %v2091_v34 = vpack.c.bf16 %v564_v31, %v562_v30 }
 0x164   : > { %2024 = vmatpush1.bf16.msra.mxu0 %v2023_v41  ;;  %1834 = vmatprep.subr.bf16.mxu1 %v1833_v42  ;;  %v528_v41 = vld [vmem:[#allocation7 + $0x490] sm:$0xff]  ;;  %v531_v42 = vld [vmem:[#allocation7 + $0x4a8] sm:$0xff] }
 0x165   : > { %2026 = vmatprep.subr.bf16.mxu0 %v2025_v46  ;;  %v2055_v44 = vpack.c.bf16 %v528_v41, %v526_v40  ;;  %v2057_v45 = vpack.c.bf16 %v533_v43, %v531_v42  ;;  %v530_v46 = vld [vmem:[#allocation7 + $0x4a0] sm:$0xff]  ;;  %v2095_v40 = vpack.c.bf16 %v568_v37, %v566_v36  ;;  %v572_v43 = vld [vmem:[#allocation7 + $0x5f0] sm:$0xff] }
 0x166   : > { %v2059_v50 = vpack.c.bf16 %v532_v47, %v530_v46  ;;  %v570_v42 = vld [vmem:[#allocation7 + $0x5e0] sm:$0xff]  ;;  %v1368_v47 = vld [vmem:[#allocation10 + $0x88] sm:$0xff] }
 0x167   : > { %1836 = vmatpush1.bf16.msra.mxu1 %v1835_v52  ;;  %v534_v52 = vld [vmem:[#allocation7 + $0x4c0] sm:$0xff] }
 0x168   : > { %2028 = vmatpush1.bf16.msra.mxu0 %v2027_v53  ;;  %1838 = vmatprep.subr.bf16.mxu1 %v1837_v54  ;;  %v536_v53 = vld [vmem:[#allocation7 + $0x4d0] sm:$0xff]  ;;  %v539_v54 = vld [vmem:[#allocation7 + $0x4e8] sm:$0xff]  ;;  %v1367_v46 = vld [vmem:[#allocation10 + $0x80] sm:$0xff] }
 0x169   : > { %2030 = vmatprep.subr.bf16.mxu0 %v2029_v58  ;;  %v2063_v56 = vpack.c.bf16 %v536_v53, %v534_v52  ;;  %v2065_v57 = vpack.c.bf16 %v541_v55, %v539_v54  ;;  %v538_v58 = vld [vmem:[#allocation7 + $0x4e0] sm:$0xff]  ;;  %v2101_v49 = vpack.c.bf16 %v1368_v47, %v1367_v46  ;;  %v1370_v52 = vld [vmem:[#allocation10 + $0x98] sm:$0xff]  ;;  %v1353_v55 = vld [vmem:[#allocation10 + $0x10] sm:$0xff] }
 0x16a   : > { %v2067_v62 = vpack.c.bf16 %v540_v59, %v538_v58  ;;  %v1372_v58 = vld [vmem:[#allocation10 + $0xa8] sm:$0xff] }
 0x16b   : > { %1840 = vmatpush1.bf16.msra.mxu1 %v1839_v0  ;;  %v542_v0 = vld [vmem:[#allocation7 + $0x500] sm:$0xff] }
 0x16c   : > { %2032 = vmatpush1.bf16.msra.mxu0 %v2031_v1  ;;  %1842 = vmatprep.subr.bf16.mxu1 %v1841_v2  ;;  %v544_v1 = vld [vmem:[#allocation7 + $0x510] sm:$0xff]  ;;  %v547_v2 = vld [vmem:[#allocation7 + $0x528] sm:$0xff] }
 0x16d   : > { %2034 = vmatprep.subr.bf16.mxu0 %v2033_v5  ;;  %v2071_v4 = vpack.c.bf16 %v544_v1, %v542_v0  ;;  %v2073_v5 = vpack.c.bf16 %v549_v3, %v547_v2  ;;  %v1374_v0 = vld [vmem:[#allocation10 + $0xb8] sm:$0xff]  ;;  %v1357_v3 = vld [vmem:[#allocation10 + $0x30] sm:$0xff] }
 0x16f   : > { %1844 = vmatpush1.bf16.msra.mxu1 %v1843_v10  ;;  %v2075_v10 = vpack.c.bf16 %v548_v7, %v546_v6  ;;  %v1376_v6 = vld [vmem:[#allocation10 + $0xc8] sm:$0xff] }
 0x170   : > { %2036 = vmatpush1.bf16.msra.mxu0 %v2035_v11  ;;  %v2077_v11 = vpack.c.bf16 %v553_v9, %v551_v8  ;;  %2102 = vmatprep.subr.bf16.mxu1 %v2101_v49  ;;  %v1359_v9 = vld [vmem:[#allocation10 + $0x40] sm:$0xff] }
 0x171   : > { %2038 = vmatprep.subr.bf16.mxu0 %v2037_v12  ;;  %v550_v12 = vld [vmem:[#allocation7 + $0x540] sm:$0xff] }
 0x172   : > { %1045 = vmatmul.mubr.f32.vlgmr.msra.gmra.mrb[0].mxu1 %v578_v17  ;;  %v2079_v16 = vpack.c.bf16 %v552_v13, %v550_v12  ;;  %v2081_v17 = vpack.c.bf16 %v557_v15, %v555_v14  ;;  %v1378_v12 = vld [vmem:[#allocation10 + $0xd8] sm:$0xff]  ;;  %v1361_v15 = vld [vmem:[#allocation10 + $0x50] sm:$0xff] }
 0x173   : > { %1258 = vmatmul.mubr.f32.vlgmr.msra.gmra.mrb[0].mxu0 %v378_v18  ;;  %v554_v18 = vld [vmem:[#allocation7 + $0x560] sm:$0xff] }
 0x174   : > { %2040 = vmatpush1.bf16.msra.mxu0 %v2039_v19  ;;  %1328 = vmatprep.mubr.f32.mxu0 %v381_v23  ;;  %v556_v19 = vld [vmem:[#allocation7 + $0x570] sm:$0xff] }
 0x175   : > { %2042 = vmatprep.subr.bf16.mxu0 %v2041_v20  ;;  %v559_v20 = vld [vmem:[#allocation7 + $0x588] sm:$0xff]  ;;  %v2083_v22 = vpack.c.bf16 %v556_v19, %v554_v18  ;;  %v1379_v18 = vld [vmem:[#allocation10 + $0xe0] sm:$0xff] }
 0x176   : > { %v2085_v23 = vpack.c.bf16 %v561_v21, %v559_v20  ;;  %v1380_v19 = vld [vmem:[#allocation10 + $0xe8] sm:$0xff]  ;;  %v1363_v21 = vld [vmem:[#allocation10 + $0x60] sm:$0xff] }
 0x177   : > { %v2125_v20 = vpack.c.bf16 %v1380_v19, %v1379_v18 }
 0x178   : > { %2044 = vmatpush1.bf16.msra.mxu0 %v2043_v26  ;;  %v563_v26 = vld [vmem:[#allocation7 + $0x5a8] sm:$0xff] }
 0x179   : > { %2046 = vmatprep.subr.bf16.mxu0 %v2045_v27  ;;  %v565_v27 = vld [vmem:[#allocation7 + $0x5b8] sm:$0xff] }
 0x17a   : > { %v2089_v29 = vpack.c.bf16 %v565_v27, %v563_v26  ;;  %v2129_v26 = vpack.c.bf16 %v1382_v25, %v1381_v24  ;;  %v1365_v27 = vld [vmem:[#allocation10 + $0x70] sm:$0xff] }
 0x17c   : > { %2048 = vmatpush1.bf16.msra.mxu0 %v2047_v32  ;;  %v567_v32 = vld [vmem:[#allocation7 + $0x5c8] sm:$0xff] }
 0x17d   : > { %2050 = vmatprep.subr.bf16.mxu0 %v2049_v33  ;;  %v569_v33 = vld [vmem:[#allocation7 + $0x5d8] sm:$0xff] }
 0x17e   : > { %v2093_v35 = vpack.c.bf16 %v569_v33, %v567_v32  ;;  %v1337_v32 = vlaneseq }
 0x180   : > { %2052 = vmatpush1.bf16.msra.mxu0 %v2051_v38  ;;  %v571_v38 = vld [vmem:[#allocation7 + $0x5e8] sm:$0xff]  ;;  %v1338_v33 = vshrl.u32 %v1337_v32, 7 }
 0x181   : > { %2054 = vmatprep.subr.bf16.mxu0 %v2053_v39  ;;  %v573_v39 = vld [vmem:[#allocation7 + $0x5f8] sm:$0xff] }
 0x182   : > { %v2097_v41 = vpack.c.bf16 %v573_v39, %v571_v38  ;;  %v1343_v36 = vsub.s32 1, %v1338_v33 }
 0x184   : > { %2056 = vmatpush1.bf16.msra.mxu0 %v2055_v44  ;;  %v2099_v44 = vpack.c.bf16 %v572_v43, %v570_v42 }
 0x185   : > { %2058 = vmatprep.subr.bf16.mxu0 %v2057_v45  ;;  %v380_v45 = vld [vmem:[%s2735_s10 + $0x20] sm:$0xff]  ;;  %s1462_s10 = scalar_lea.sflag [#allocation4], %s2731_s0 }
 0x188   : > { %2060 = vmatpush1.bf16.msra.mxu0 %v2059_v50  ;;  %v1352_v50 = vld [vmem:[#allocation10 + $0x8] sm:$0xff] }
 0x189   : > { %2062 = vmatprep.subr.bf16.mxu0 %v2061_v51  ;;  %v1369_v51 = vld [vmem:[#allocation10 + $0x90] sm:$0xff]  ;;  %v2103_v53 = vpack.c.bf16 %v1352_v50, %v1351_v48  ;;  %v1612_v48 = vld [vmem:[%s2832_s6] ss:$0 sm:$0xff] }
 0x18a   : > { %v2105_v54 = vpack.c.bf16 %v1370_v52, %v1369_v51 }
 0x18b   : > { %2104 = vmatpush3.bf16.msra.mxu1 %v2103_v53 }
 0x18c   : > { %2064 = vmatpush1.bf16.msra.mxu0 %v2063_v56  ;;  %v1354_v56 = vld [vmem:[#allocation10 + $0x18] sm:$0xff]  ;;  %2106 = vmatprep.subr.bf16.mxu1 %v2105_v54 }
 0x18d   : > { %2066 = vmatprep.subr.bf16.mxu0 %v2065_v57  ;;  %v1371_v57 = vld [vmem:[#allocation10 + $0xa0] sm:$0xff]  ;;  %v2107_v59 = vpack.c.bf16 %v1354_v56, %v1353_v55 }
 0x18e   : > { %v2109_v60 = vpack.c.bf16 %v1372_v58, %v1371_v57 }
 0x18f   : > { %2108 = vmatpush3.bf16.msra.mxu1 %v2107_v59 }
 0x190   : > { %2068 = vmatpush1.bf16.msra.mxu0 %v2067_v62  ;;  %v1356_v62 = vld [vmem:[#allocation10 + $0x28] sm:$0xff]  ;;  %2110 = vmatprep.subr.bf16.mxu1 %v2109_v60 }
 0x191   : > { %2070 = vmatprep.subr.bf16.mxu0 %v2069_v63  ;;  %v1373_v63 = vld [vmem:[#allocation10 + $0xb0] sm:$0xff]  ;;  %v2111_v1 = vpack.c.bf16 %v1356_v62, %v1355_v61 }
 0x192   : > { %v2113_v2 = vpack.c.bf16 %v1374_v0, %v1373_v63 }
 0x193   : > { %2112 = vmatpush3.bf16.msra.mxu1 %v2111_v1 }
 0x194   : > { %2072 = vmatpush1.bf16.msra.mxu0 %v2071_v4  ;;  %v1358_v4 = vld [vmem:[#allocation10 + $0x38] sm:$0xff]  ;;  %2114 = vmatprep.subr.bf16.mxu1 %v2113_v2 }
 0x195   : > { %2074 = vmatprep.subr.bf16.mxu0 %v2073_v5  ;;  %v1375_v5 = vld [vmem:[#allocation10 + $0xc0] sm:$0xff]  ;;  %v2115_v7 = vpack.c.bf16 %v1358_v4, %v1357_v3 }
 0x196   : > { %v2117_v8 = vpack.c.bf16 %v1376_v6, %v1375_v5 }
 0x197   : > { %2116 = vmatpush3.bf16.msra.mxu1 %v2115_v7 }
 0x198   : > { %2076 = vmatpush1.bf16.msra.mxu0 %v2075_v10  ;;  %v1360_v10 = vld [vmem:[#allocation10 + $0x48] sm:$0xff]  ;;  %2118 = vmatprep.subr.bf16.mxu1 %v2117_v8 }
 0x199   : > { %2078 = vmatprep.subr.bf16.mxu0 %v2077_v11  ;;  %v1377_v11 = vld [vmem:[#allocation10 + $0xd0] sm:$0xff]  ;;  %v2119_v13 = vpack.c.bf16 %v1360_v10, %v1359_v9 }
 0x19a   : > { %v2121_v14 = vpack.c.bf16 %v1378_v12, %v1377_v11 }
 0x19b   : > { %2120 = vmatpush3.bf16.msra.mxu1 %v2119_v13 }
 0x19c   : > { %2080 = vmatpush1.bf16.msra.mxu0 %v2079_v16  ;;  %v1362_v16 = vld [vmem:[#allocation10 + $0x58] sm:$0xff]  ;;  %2122 = vmatprep.subr.bf16.mxu1 %v2121_v14 }
 0x19d   : > { %2082 = vmatprep.subr.bf16.mxu0 %v2081_v17  ;;  %v2123_v17 = vpack.c.bf16 %v1362_v16, %v1361_v15 }
 0x19f   : > { %2124 = vmatpush3.bf16.msra.mxu1 %v2123_v17 }
 0x1a0   : > { %2084 = vmatpush1.bf16.msra.mxu0 %v2083_v22  ;;  %v1364_v22 = vld [vmem:[#allocation10 + $0x68] sm:$0xff]  ;;  %2126 = vmatprep.subr.bf16.mxu1 %v2125_v20 }
 0x1a1   : > { %2086 = vmatprep.subr.bf16.mxu0 %v2085_v23  ;;  %v2127_v23 = vpack.c.bf16 %v1364_v22, %v1363_v21 }
 0x1a3   : > { %2128 = vmatpush3.bf16.msra.mxu1 %v2127_v23 }
 0x1a4   : > { %2088 = vmatpush1.bf16.msra.mxu0 %v2087_v28  ;;  %v1366_v28 = vld [vmem:[#allocation10 + $0x78] sm:$0xff]  ;;  %2130 = vmatprep.subr.bf16.mxu1 %v2129_v26 }
 0x1a5   : > { %2090 = vmatprep.subr.bf16.mxu0 %v2089_v29  ;;  %v2131_v29 = vpack.c.bf16 %v1366_v28, %v1365_v27 }
 0x1a7   : > { %2132 = vmatpush3.bf16.msra.mxu1 %v2131_v29 }
 0x1a8   : > { %2092 = vmatpush1.bf16.msra.mxu0 %v2091_v34  ;;  %v1339_v34 = vsub.s32 0, %v1338_v33 }
 0x1a9   : > { %2094 = vmatprep.subr.bf16.mxu0 %v2093_v35  ;;  %v1335_v35 = vld [vmem:[%s2830_s4] sm:$0x3] }
 0x1aa   : > { %v1340_v37 = vrot.slane %v1335_v35, %v1339_v34  ;;  %v1344_v39 = vrot.slane %v1335_v35, %v1343_v36 }
 0x1ac   : > { %2096 = vmatpush1.bf16.msra.mxu0 %v2095_v40 }
 0x1ad   : > { %2098 = vmatprep.subr.bf16.mxu0 %v2097_v41 }
 0x1b0   : > { %2100 = vmatpush1.bf16.msra.mxu0 %v2099_v44 }
 0x1b3   : > { %1329 = vmatmul.mubr.f32.vlgmr.msra.gmra.mrb[0].mxu0 %v380_v45 }
 0x245   : > { %v1046_v30 = vpop.f32.mrb[0].mxu1 }
 0x246   : > { %v1048_v31 = vpop.f32.mrb[1].mxu1 }
 0x286   : > { %v1330_v38 = vpop.f32.mrb[0].mxu0 }
 0x287   : > { %v2133_v40 = vadd.f32 %v1330_v38, %v1046_v30  ;;  %v1332_v41 = vpop.f32.mrb[1].mxu0 }
 0x288   : > { %v2134_v42 = vadd.f32 %v1332_v41, %v1048_v31 }
 0x289   : > { %v1347_v43 = vadd.f32 %v2133_v40, %v1340_v37 }
 0x28a   : > { %v1348_v44 = vadd.f32 %v2134_v42, %v1344_v39 }
 0x28b   : > { %v1349_v46 = vmax.f32 %v1347_v43, 0.0 }
 0x28c   : > { %v1350_v45 = vmax.f32 %v1348_v44, 0.0 }
 0x28e   : > { %1454 = vmatprep.mubr.f32.mxu1 %v1350_v45 }
 0x28f   : > { %1455 = vmatmul.mubr.f32.vlgmr.msra.gmra.mrb[2].mxu1 %v1349_v46 }
 0x362   : > { %v1650_v47 = vpop.f32.mrb[2].mxu1 }
 0x363   : > { %v1651_v49 = vpop.f32.mrb[3].mxu1 }
 0x364   : > { %v1652_v50 = vadd.f32 %v1651_v49, %v1650_v47 }
 0x366   : > { %v1457_v51 = vadd.f32 %v1652_v50, %v1612_v48 }
 0x368   : > { %1460 = vst [vmem:[%s375_s17] sm:$0xff] %v1457_v51 }
 0x369   : > { %2391 = shalt.err (!%p2388_p10)
}
 0x36a   : > { %s2392_s0 = scalar_lea.hbm %s2782_s20, 128  ;;  %s2396_s2 = scalar_lea.hbm %s2833_s7, 256 }
 0x36b   : > { %p2393_p13 = scmp.ne.s32.totalorder %s2782_s20, %s2392_s0  ;;  %p2397_p9 = scmp.lt.u32.totalorder %s2782_s20, %s2833_s7 }
 0x36c   : > { %p2398_p3 = scmp.lt.u32.totalorder %s2396_s2, %s2392_s0  ;;  %p2400_p12 = scmp.lt.u32.totalorder %s2392_s0, %s2782_s20 }
 0x36d   : > { %p2394_p5 = pnand %p2393_p13, %p2858_p2 }
 0x36e   : > { %p2399_p7 = por %p2398_p3, %p2397_p9 }
 0x36f   : > { %p2395_p11 = pneg %p2394_p5 }
 0x370   : > { %p2401_p1 = por %p2400_p12, %p2399_p7 }
 0x372   : > { %p2402_p4 = pnand %p2401_p1, %p2395_p11 }
 0x374   : > { %2405 = shalt.err (!%p2402_p4)
}
 0x375   : > { %2164 = dma.vmem_to_hbm [thread:$0]  (%p2858_p2), %s2784_s23, 128, %s2782_s20, %s1462_s10  }
 0x376 PF: > { %s2859_s16 = sld [smem:[#allocation17_spill]]  ;;  %s1487_s14 = sand.u32 1, %s2444_s24  }
 0x377   : > { %p2861_p8 = scmp.ge.s32.totalorder %s2456_s27, 2  ;;  %s1488_s17 = scalar_lea.sflag [#allocation4], %s1487_s14 }
 0x37c   : > { %p2860_p0 = scmp.ne.s32.totalorder %s2859_s16, 0 }
 0x37e   : > { %p2184_p6 = pnand %p2861_p8, %p2860_p0 }
 0x380   : > { %2439 = dma.done.wait (!%p2184_p6), %s1488_s17, 128  }
 0x381   : > { %2441 = vsyncadd (!%p2184_p6), %s1488_s17, 4294967168  ;;  %p24_p10 = scmp.ge.s32.totalorder %s2639_s8, 4   ;;  %s2862_s24 = smov %s2448_s25 }
 0x382   : > { %s2863_s25 = smov %s2452_s26  ;;  %s2864_s26 = smov %s2649_s19 }
 0x383   : > { %s2865_s27 = smov %s2639_s8  ;;  %26 = sbr.rel (!%p24_p10) target bundleno = 11 (0xb), region = 118 }
 0x38a   :  { %1493 = vsyncpa [#allocation3], 1 }
 0x38b   :  { %1495 = vsyncpa [#allocation3 + $0x1], 1 }
 0x38c   :  { %1496 = vsyncpa [#allocation6], 1 }
 0x38d   :  { %1498 = vsyncpa [#allocation6 + $0x1], 1 }
 0x38e   :  { %1499 = vsyncpa [#allocation9], 1 }
 0x38f   :  { %1500 = vsyncpa [#allocation4], 1 }
 0x390   :  { %1502 = vsyncpa [#allocation4 + $0x1], 1 }

</bundles_post_ra>
